<compile_context>
chip_gen: v7x
topology: tpu7x:2x2x1
jax: 0.10.0
libtpu: 0.0.40
codegen_flags: <defaults>
</compile_context>

<pallas_src>
import functools

import jax
import jax.numpy as jnp
from jax.experimental import pallas as pl
from jax.experimental.pallas import tpu as pltpu


def _round_up(x, m):
    return ((x + m - 1) // m) * m


def _e2e_kernel(patch_ref, wconv_ref, bconv_ref, wcls_ref, bcls_ref, out_ref,
                *, bt, hw, hp):
    # 1) Conv as one MXU matmul over the full-K (un-padded) bf16 im2col tile;
    #    Mosaic pads the K=36 contraction dim internally.
    h = jnp.dot(patch_ref[...], wconv_ref[...],
                preferred_element_type=jnp.float32)            # (bt*hw, hp) f32
    # 2) Bias + ReLU in f32 on the VPU.
    h = jnp.maximum(h + bconv_ref[...], 0.0)
    # 3) Segmented global average pool: row tiles are batch-aligned, so a
    #    leading-dim reshape + sublane reduction replaces the old dense pooling
    #    matmul.  1/HW is applied once, in f32, here in the epilogue.
    z = jnp.sum(h.reshape(bt, hw, hp), axis=1) * (1.0 / hw)    # (bt, hp) f32
    # 4) Classifier matmul (bf16 operands, f32 accumulation), lane-dense store.
    y = jnp.dot(z.astype(wcls_ref.dtype), wcls_ref[...],
                preferred_element_type=jnp.float32) + bcls_ref[...]
    out_ref[...] = y.astype(out_ref.dtype)                      # (bt, Np)


@jax.jit
def e2enet_forward(x, w_conv, b_conv, w_cls, b_cls):
    """x: (B, C, H, W) float32 (NCHW, as in PyTorch)."""
    B, C, H, W = x.shape
    C_hid = w_conv.shape[0]
    ncls = w_cls.shape[0]
    HW = H * W
    K = C * 9                                   # im2col feature dim, NOT padded

    # Lane-dense padded feature dims (kept at 128; do not pad to 256).
    Hp = _round_up(max(C_hid, 128), 128)
    Np = _round_up(max(ncls, 128), 128)

    # Batch-aligned row tiling: BT whole batch elements per grid step.
    BT = 8
    Bp = _round_up(B, BT)
    num_tiles = Bp // BT
    tile_rows = BT * HW                          # multiple of HW (2048 here)
    Rp = Bp * HW

    # --- glue: im2col (padding=1, 3x3), feature order (c, kh, kw) matches
    # PyTorch's weight.reshape(out, -1).  Fused by XLA under the enclosing jit.
    xp = jnp.pad(x, ((0, 0), (0, 0), (1, 1), (1, 1)))
    taps = [xp[:, :, dh:dh + H, dw:dw + W] for dh in range(3) for dw in range(3)]
    patches = jnp.stack(taps, axis=2)                            # (B, C, 9, H, W)
    patches = patches.transpose(0, 3, 4, 1, 2).reshape(B * HW, K)
    patches = jnp.pad(patches, ((0, Rp - B * HW), (0, 0))).astype(jnp.bfloat16)

    # --- glue: weights, bf16 for the MXU (f32 biases).  Only the output-feature
    # dims are padded to lane width; K stays native.
    wconv = jnp.pad(w_conv.reshape(C_hid, K).T,
                    ((0, 0), (0, Hp - C_hid))).astype(jnp.bfloat16)     # (K, Hp)
    bconv = jnp.pad(b_conv, (0, Hp - C_hid)).reshape(1, Hp).astype(jnp.float32)
    wcls = jnp.pad(w_cls.T,
                   ((0, Hp - C_hid), (0, Np - ncls))).astype(jnp.bfloat16)  # (Hp, Np)
    bcls = jnp.pad(b_cls, (0, Np - ncls)).reshape(1, Np).astype(jnp.float32)

    kernel = functools.partial(_e2e_kernel, bt=BT, hw=HW, hp=Hp)

    out = pl.pallas_call(
        kernel,
        out_shape=jax.ShapeDtypeStruct((Bp, Np), jnp.float32),
        grid=(num_tiles,),
        in_specs=[
            pl.BlockSpec((tile_rows, K), lambda i: (i, 0)),   # batch-group patch rows
            pl.BlockSpec((K, Hp), lambda i: (0, 0)),          # conv weight (resident)
            pl.BlockSpec((1, Hp), lambda i: (0, 0)),
            pl.BlockSpec((Hp, Np), lambda i: (0, 0)),         # cls weight (resident)
            pl.BlockSpec((1, Np), lambda i: (0, 0)),
        ],
        out_specs=pl.BlockSpec((BT, Np), lambda i: (i, 0)),   # disjoint rows per step
        compiler_params=pltpu.CompilerParams(
            # Each step owns a disjoint batch group -> safe to parallelize
            # (shards across v7x's 2 TensorCores; no-op on v5e/v6e).
            dimension_semantics=("parallel",),
            vmem_limit_bytes=32 * 1024 * 1024),
    )(patches, wconv, bconv, wcls, bcls)

    # Padded batch rows / padded class lanes carry garbage by construction
    # (segmented pooling never mixes batch elements); slice them off.
    return out[:B, :ncls]


def _reference_forward(x, w_conv, b_conv, w_cls, b_cls):
    """Pure-JAX reference mirroring PyTorch: conv(pad=1) -> relu -> GAP -> linear."""
    y = jax.lax.conv_general_dilated(
        x, w_conv, window_strides=(1, 1), padding=((1, 1), (1, 1)),
        dimension_numbers=("NCHW", "OIHW", "NCHW"))
    y = y + b_conv[None, :, None, None]
    y = jnp.maximum(y, 0.0)
    z = jnp.mean(y, axis=(2, 3))                                 # (B, hid)
    return z @ w_cls.T + b_cls[None, :]                          # (B, ncls)


if __name__ == "__main__":
    # Small shapes consistent with the module's NCHW image-like input.
    B, C, H, W = 2, 4, 16, 16
    C_hid, num_classes = 32, 8

    key = jax.random.PRNGKey(0)
    kx, kw1, kb1, kw2, kb2 = jax.random.split(key, 5)

    x = jax.random.normal(kx, (B, C, H, W), dtype=jnp.float32)
    w_conv = 0.1 * jax.random.normal(kw1, (C_hid, C, 3, 3), dtype=jnp.float32)
    b_conv = 0.1 * jax.random.normal(kb1, (C_hid,), dtype=jnp.float32)
    w_cls = 0.1 * jax.random.normal(kw2, (num_classes, C_hid), dtype=jnp.float32)
    b_cls = 0.1 * jax.random.normal(kb2, (num_classes,), dtype=jnp.float32)

    y = e2enet_forward(x, w_conv, b_conv, w_cls, b_cls)
    y = jax.block_until_ready(y)

    y_ref = _reference_forward(x, w_conv, b_conv, w_cls, b_cls)
    assert y.shape == (B, num_classes)
    # bf16 MXU inputs -> looser tolerance than the pure-f32 reference.
    assert jnp.allclose(y, y_ref, atol=2e-2, rtol=2e-2), (
        "mismatch vs reference: max abs err = "
        f"{float(jnp.max(jnp.abs(y - y_ref)))}")

    print("KERNEL_OK")
</pallas_src>

<mosaic_0001>
module attributes {stable_mosaic.version = 11 : i64} {
  func.func @_e2e_kernel(%arg0: i32, %arg1: memref<2048x36xbf16, #tpu.memory_space<vmem>>, %arg2: memref<36x128xbf16, #tpu.memory_space<vmem>>, %arg3: memref<1x128xf32, #tpu.memory_space<vmem>>, %arg4: memref<128x128xbf16, #tpu.memory_space<vmem>>, %arg5: memref<1x128xf32, #tpu.memory_space<vmem>>, %arg6: memref<8x128xf32, #tpu.memory_space<vmem>>) attributes {dimension_semantics = [#tpu.dimension_semantics<parallel>], iteration_bounds = array<i64: 1>, scalar_prefetch = 0 : i64, scratch_operands = 0 : i64, tpu.core_type = #tpu.core_type<tc>, window_params = [{transform_indices = @transform_0, window_bounds = array<i64: 2048, 36>}, {pipeline_mode = #tpu.pipeline_mode<synchronous>, transform_indices = @transform_1, window_bounds = array<i64: 36, 128>}, {pipeline_mode = #tpu.pipeline_mode<synchronous>, transform_indices = @transform_2, window_bounds = array<i64: 1, 128>}, {pipeline_mode = #tpu.pipeline_mode<synchronous>, transform_indices = @transform_3, window_bounds = array<i64: 128, 128>}, {pipeline_mode = #tpu.pipeline_mode<synchronous>, transform_indices = @transform_4, window_bounds = array<i64: 1, 128>}, {transform_indices = @transform_5, window_bounds = array<i64: 8, 128>}]} {
    %c0 = arith.constant 0 : index
    %c0_0 = arith.constant 0 : index
    %0 = vector.load %arg1[%c0, %c0_0] : memref<2048x36xbf16, #tpu.memory_space<vmem>>, vector<2048x36xbf16>
    %c0_1 = arith.constant 0 : index
    %c0_2 = arith.constant 0 : index
    %1 = vector.load %arg2[%c0_1, %c0_2] : memref<36x128xbf16, #tpu.memory_space<vmem>>, vector<36x128xbf16>
    %cst = arith.constant dense<0.000000e+00> : vector<2048x128xf32>
    %2 = tpu.matmul %0, %1, %cst {dimension_numbers = #tpu.dot_dimension_numbers<[1], [0], [0], [1], [0, 0, 1, 1], [], []>} : vector<2048x36xbf16>, vector<36x128xbf16>, vector<2048x128xf32> -> vector<2048x128xf32>
    %c0_3 = arith.constant 0 : index
    %c0_4 = arith.constant 0 : index
    %3 = vector.load %arg3[%c0_3, %c0_4] : memref<1x128xf32, #tpu.memory_space<vmem>>, vector<1x128xf32>
    %4 = vector.broadcast %3 : vector<1x128xf32> to vector<2048x128xf32>
    %5 = arith.addf %2, %4 : vector<2048x128xf32>
    %cst_5 = arith.constant 0.000000e+00 : f32
    %6 = vector.broadcast %cst_5 : f32 to vector<2048x128xf32>
    %7 = arith.maximumf %5, %6 : vector<2048x128xf32>
    %8 = vector.shape_cast %7 : vector<2048x128xf32> to vector<8x256x128xf32>
    %cst_6 = arith.constant dense<0.000000e+00> : vector<8x128xf32>
    %9 = vector.multi_reduction <add>, %8, %cst_6 [1] : vector<8x256x128xf32> to vector<8x128xf32>
    %cst_7 = arith.constant 3.906250e-03 : f32
    %10 = vector.broadcast %cst_7 : f32 to vector<8x128xf32>
    %11 = arith.mulf %9, %10 : vector<8x128xf32>
    %12 = arith.truncf %11 : vector<8x128xf32> to vector<8x128xbf16>
    %c0_8 = arith.constant 0 : index
    %c0_9 = arith.constant 0 : index
    %13 = vector.load %arg4[%c0_8, %c0_9] : memref<128x128xbf16, #tpu.memory_space<vmem>>, vector<128x128xbf16>
    %cst_10 = arith.constant dense<0.000000e+00> : vector<8x128xf32>
    %14 = tpu.matmul %12, %13, %cst_10 {dimension_numbers = #tpu.dot_dimension_numbers<[1], [0], [0], [1], [0, 0, 1, 1], [], []>} : vector<8x128xbf16>, vector<128x128xbf16>, vector<8x128xf32> -> vector<8x128xf32>
    %c0_11 = arith.constant 0 : index
    %c0_12 = arith.constant 0 : index
    %15 = vector.load %arg5[%c0_11, %c0_12] : memref<1x128xf32, #tpu.memory_space<vmem>>, vector<1x128xf32>
    %16 = vector.broadcast %15 : vector<1x128xf32> to vector<8x128xf32>
    %17 = arith.addf %14, %16 : vector<8x128xf32>
    %c0_13 = arith.constant 0 : index
    %c0_14 = arith.constant 0 : index
    %18 = vector.load %arg6[%c0_13, %c0_14] : memref<8x128xf32, #tpu.memory_space<vmem>>, vector<8x128xf32>
    tpu.vector_store %arg6[%c0_13, %c0_14], %17 {strides = array<i32>} : memref<8x128xf32, #tpu.memory_space<vmem>>, vector<8x128xf32>,
    return
  }
  func.func @transform_0(%arg0: i32) -> (i32, i32) {
    %c0_i32 = arith.constant 0 : i32
    %c0_i32_0 = arith.constant 0 : i32
    return %arg0, %c0_i32 : i32, i32
  }
  func.func @transform_1(%arg0: i32) -> (i32, i32) {
    %c0_i32 = arith.constant 0 : i32
    %c0_i32_0 = arith.constant 0 : i32
    %c0_i32_1 = arith.constant 0 : i32
    return %c0_i32, %c0_i32_0 : i32, i32
  }
  func.func @transform_2(%arg0: i32) -> (i32, i32) {
    %c0_i32 = arith.constant 0 : i32
    %c0_i32_0 = arith.constant 0 : i32
    %c0_i32_1 = arith.constant 0 : i32
    return %c0_i32, %c0_i32_0 : i32, i32
  }
  func.func @transform_3(%arg0: i32) -> (i32, i32) {
    %c0_i32 = arith.constant 0 : i32
    %c0_i32_0 = arith.constant 0 : i32
    %c0_i32_1 = arith.constant 0 : i32
    return %c0_i32, %c0_i32_0 : i32, i32
  }
  func.func @transform_4(%arg0: i32) -> (i32, i32) {
    %c0_i32 = arith.constant 0 : i32
    %c0_i32_0 = arith.constant 0 : i32
    %c0_i32_1 = arith.constant 0 : i32
    return %c0_i32, %c0_i32_0 : i32, i32
  }
  func.func @transform_5(%arg0: i32) -> (i32, i32) {
    %c0_i32 = arith.constant 0 : i32
    %c0_i32_0 = arith.constant 0 : i32
    return %arg0, %c0_i32 : i32, i32
  }
}

</mosaic_0001>

<bundles_post_ra>
// kernel: e2enet_forward.1
= control target key start
LH: loop header
LB: loop body
LE: loop exit
PB: predicated region body
PF: predicated region fallthrough
CT: control target
= control target key end

     0   :  { %vm944_vm0 = vcmask 293888   ;;  %vm1329_vm1 = vcmask 1041408   ;;  %vm2997_vm2 = vcmask 1041409   ;;  %vm3949_vm3 = vmmov 0   ;;  %s4921_s1 = inlined_call_operand.vmem [shape: bf16[36,128], index: 1, kind: input, shape index: {}]   ;;  %s4922_s0 = inlined_call_operand.vmem [shape: bf16[2048,36], index: 0, kind: input, shape index: {}]   ;;  %s4923_s3 = inlined_call_operand.vmem [shape: bf16[128,128], index: 3, kind: input, shape index: {}]   ;;  %s4924_s2 = inlined_call_operand.vmem [shape: f32[1,128], index: 2, kind: input, shape index: {}]   ;;  %s4925_s4 = inlined_call_operand.vmem [shape: f32[1,128], index: 4, kind: input, shape index: {}]   ;;  %s4926_s5 = inlined_call_operand.vmem [shape: f32[8,128], index: 5, kind: output, shape index: {}]  }
   0x1   :  { %v3807_v0 = vld [vmem:[%s4921_s1] sm:$0xff]   ;;  %v3808_v1 = vld [vmem:[%s4921_s1 + $0x8] sm:$0xff]   ;;  %v3809_v2 = vld [vmem:[%s4921_s1 + $0x10] ss:$0 sps:$4 sm:$0x33]   ;;  %vm2999_vm4 = vcmask 1042434  }
   0x2   :  { %3515 = vmatprep.subr.bf16.mxu0 %v3807_v0  ;;  %v3810_v3 = vld [vmem:[%s4922_s0] sm:$0xff]   ;;  %3797 = vmatprep.subr.bf16.mxu1 %v3807_v0  ;;  %v1331_v4 = vsel %vm1329_vm1, %v3809_v2, 0  ;;  %v3811_v5 = vld [vmem:[%s4922_s0 + $0x8] sm:$0xff]   ;;  %v3812_v6 = vld [vmem:[%s4922_s0 + $0x10] sm:$0xff]   ;;  %vm3001_vm5 = vcmask 1043459   ;;  %vm3003_vm6 = vcmask 1044484  }
   0x3   :  { %3516 = vmatpush3.bf16.msra.mxu0 %v3807_v0  ;;  %3800 = vmatpush3.bf16.msra.mxu1 %v3807_v0  ;;  %v3813_v7 = vld [vmem:[%s4922_s0 + $0x18] sm:$0xff]   ;;  %v3814_v8 = vld [vmem:[%s4922_s0 + $0x20] sm:$0xff]   ;;  %v3826_v9 = vld [vmem:[%s4922_s0 + $0x210] sm:$0xff]   ;;  %vm3005_vm7 = vcmask 1045509   ;;  %vm3007_vm8 = vcmask 1046534   ;;  %vm3009_vm9 = vcmask 1047559  }
   0x4   :  { %3517 = vmatprep.subr.bf16.mxu0 %v3808_v1  ;;  %3521 = vmatprep.mubr.msk.bf16.mxu0 %vm944_vm0, %v3810_v3  ;;  %v3827_v10 = vld [vmem:[%s4922_s0 + $0x218] sm:$0xff]   ;;  %v3830_v11 = vld [vmem:[%s4922_s0 + $0x220] sm:$0xff]   ;;  %v3815_v12 = vld [vmem:[%s4922_s0 + $0x28] sm:$0xff]  }
   0x5   :  { %3798 = vmatprep.subr.bf16.mxu1 %v3808_v1  ;;  %3653 = vmatprep.mubr.msk.bf16.mxu1 %vm944_vm0, %v3826_v9  ;;  %v3816_v13 = vld [vmem:[%s4922_s0 + $0x30] sm:$0xff]   ;;  %v3831_v14 = vld [vmem:[%s4922_s0 + $0x228] sm:$0xff]   ;;  %v3817_v16 = vld [vmem:[%s4922_s0 + $0x38] sm:$0xff]  }
   0x6   :  { %v3834_v15 = vld [vmem:[%s4922_s0 + $0x230] sm:$0xff]   ;;  %v3818_v17 = vld [vmem:[%s4922_s0 + $0x40] sm:$0xff]   ;;  %v3835_v18 = vld [vmem:[%s4922_s0 + $0x238] sm:$0xff]  }
   0x7   :  { %3518 = vmatpush3.bf16.msra.mxu0 %v3808_v1  ;;  %3801 = vmatpush3.bf16.msra.mxu1 %v3808_v1  ;;  %v3838_v19 = vld [vmem:[%s4922_s0 + $0x240] sm:$0xff]   ;;  %v3819_v20 = vld [vmem:[%s4922_s0 + $0x48] sm:$0xff]   ;;  %v3820_v21 = vld [vmem:[%s4922_s0 + $0x50] sm:$0xff]  }
   0x8   :  { %3803 = vmatprep.subr.msk.bf16.mxu0 %vm1329_vm1, %v3809_v2  ;;  %3804 = vmatprep.subr.msk.bf16.mxu1 %vm1329_vm1, %v3809_v2  ;;  %v3839_v22 = vld [vmem:[%s4922_s0 + $0x248] sm:$0xff]   ;;  %v3842_v23 = vld [vmem:[%s4922_s0 + $0x250] sm:$0xff]   ;;  %v3821_v24 = vld [vmem:[%s4922_s0 + $0x58] sm:$0xff]  }
   0x9   :  { %v3822_v25 = vld [vmem:[%s4922_s0 + $0x60] sm:$0xff]   ;;  %v3843_v26 = vld [vmem:[%s4922_s0 + $0x258] sm:$0xff]   ;;  %v3823_v28 = vld [vmem:[%s4922_s0 + $0x68] sm:$0xff]  }
   0xa   :  { %v3846_v27 = vld [vmem:[%s4922_s0 + $0x260] sm:$0xff]   ;;  %v3824_v29 = vld [vmem:[%s4922_s0 + $0x70] sm:$0xff]   ;;  %v3847_v30 = vld [vmem:[%s4922_s0 + $0x268] sm:$0xff]  }
   0xb   :  { %3520 = vmatpush3.bf16.msra.mxu0 %v1331_v4  ;;  %3802 = vmatpush3.bf16.msra.mxu1 %v1331_v4  ;;  %v3850_v31 = vld [vmem:[%s4922_s0 + $0x270] sm:$0xff]   ;;  %v3825_v32 = vld [vmem:[%s4922_s0 + $0x78] sm:$0xff]   ;;  %v3828_v33 = vld [vmem:[%s4922_s0 + $0x80] sm:$0xff]  }
   0xc   :  { %v3851_v34 = vld [vmem:[%s4922_s0 + $0x278] sm:$0xff]   ;;  %v3854_v35 = vld [vmem:[%s4922_s0 + $0x280] sm:$0xff]   ;;  %v3829_v36 = vld [vmem:[%s4922_s0 + $0x88] sm:$0xff]  }
   0xd   :  { %v3832_v37 = vld [vmem:[%s4922_s0 + $0x90] sm:$0xff]   ;;  %v3855_v38 = vld [vmem:[%s4922_s0 + $0x288] sm:$0xff]   ;;  %v3833_v40 = vld [vmem:[%s4922_s0 + $0x98] sm:$0xff]  }
   0xe   :  { %3522 = vmatmul.mubr.msk.bf16.vlgmr.msra.gmra.mrb[0].mxu0 %vm944_vm0, %v3811_v5  ;;  %3654 = vmatmul.mubr.msk.bf16.vlgmr.msra.gmra.mrb[0].mxu1 %vm944_vm0, %v3827_v10  ;;  %v3858_v39 = vld [vmem:[%s4922_s0 + $0x290] sm:$0xff]   ;;  %v3836_v41 = vld [vmem:[%s4922_s0 + $0xa0] sm:$0xff]   ;;  %v3859_v42 = vld [vmem:[%s4922_s0 + $0x298] sm:$0xff]  }
   0xf   :  { %3525 = vmatprep.mubr.msk.bf16.mxu0 %vm944_vm0, %v3812_v6  ;;  %3657 = vmatprep.mubr.msk.bf16.mxu1 %vm944_vm0, %v3830_v11  ;;  %v3862_v43 = vld [vmem:[%s4922_s0 + $0x2a0] sm:$0xff]   ;;  %v3837_v44 = vld [vmem:[%s4922_s0 + $0xa8] sm:$0xff]   ;;  %v3840_v45 = vld [vmem:[%s4922_s0 + $0xb0] sm:$0xff]  }
  0x10   :  { %v3863_v46 = vld [vmem:[%s4922_s0 + $0x2a8] sm:$0xff]   ;;  %v3866_v47 = vld [vmem:[%s4922_s0 + $0x2b0] sm:$0xff]   ;;  %v3841_v48 = vld [vmem:[%s4922_s0 + $0xb8] sm:$0xff]  }
  0x11   :  { %v3844_v49 = vld [vmem:[%s4922_s0 + $0xc0] sm:$0xff]   ;;  %v3867_v50 = vld [vmem:[%s4922_s0 + $0x2b8] sm:$0xff]   ;;  %v3845_v52 = vld [vmem:[%s4922_s0 + $0xc8] sm:$0xff]  }
  0x12   :  { %v3870_v51 = vld [vmem:[%s4922_s0 + $0x2c0] sm:$0xff]   ;;  %v3848_v53 = vld [vmem:[%s4922_s0 + $0xd0] sm:$0xff]   ;;  %v3871_v54 = vld [vmem:[%s4922_s0 + $0x2c8] sm:$0xff]  }
  0x13   :  { %v3874_v55 = vld [vmem:[%s4922_s0 + $0x2d0] sm:$0xff]   ;;  %v3849_v56 = vld [vmem:[%s4922_s0 + $0xd8] sm:$0xff]   ;;  %v3852_v57 = vld [vmem:[%s4922_s0 + $0xe0] sm:$0xff]  }
  0x14   :  { %v3875_v58 = vld [vmem:[%s4922_s0 + $0x2d8] sm:$0xff]   ;;  %v3878_v59 = vld [vmem:[%s4922_s0 + $0x2e0] sm:$0xff]   ;;  %v3853_v60 = vld [vmem:[%s4922_s0 + $0xe8] sm:$0xff]  }
  0x15   :  { %v3856_v61 = vld [vmem:[%s4922_s0 + $0xf0] sm:$0xff]   ;;  %v3879_v62 = vld [vmem:[%s4922_s0 + $0x2e8] sm:$0xff]   ;;  %v3857_v0 = vld [vmem:[%s4922_s0 + $0xf8] sm:$0xff]  }
  0x16   :  { %3526 = vmatmul.mubr.msk.bf16.gmra.mrb[4].mxu0 %vm944_vm0, %v3813_v7  ;;  %3658 = vmatmul.mubr.msk.bf16.gmra.mrb[4].mxu1 %vm944_vm0, %v3831_v14  ;;  %v3882_v63 = vld [vmem:[%s4922_s0 + $0x2f0] sm:$0xff]   ;;  %v3883_v1 = vld [vmem:[%s4922_s0 + $0x2f8] sm:$0xff]   ;;  %v3860_v2 = vld [vmem:[%s4922_s0 + $0x100] sm:$0xff]  }
  0x17   :  { %3529 = vmatprep.mubr.msk.bf16.mxu0 %vm944_vm0, %v3814_v8  ;;  %3661 = vmatprep.mubr.msk.bf16.mxu1 %vm944_vm0, %v3834_v15  ;;  %v3886_v3 = vld [vmem:[%s4922_s0 + $0x300] sm:$0xff]   ;;  %v3861_v4 = vld [vmem:[%s4922_s0 + $0x108] sm:$0xff]   ;;  %v3864_v6 = vld [vmem:[%s4922_s0 + $0x110] sm:$0xff]  }
  0x18   :  { %v3887_v5 = vld [vmem:[%s4922_s0 + $0x308] sm:$0xff]   ;;  %v3890_v7 = vld [vmem:[%s4922_s0 + $0x310] sm:$0xff]   ;;  %v3865_v8 = vld [vmem:[%s4922_s0 + $0x118] sm:$0xff]  }
  0x19   :  { %v3891_v9 = vld [vmem:[%s4922_s0 + $0x318] sm:$0xff]   ;;  %v3868_v10 = vld [vmem:[%s4922_s0 + $0x120] sm:$0xff]   ;;  %v3872_v14 = vld [vmem:[%s4922_s0 + $0x130] sm:$0xff]  }
  0x1a   :  { %v3894_v11 = vld [vmem:[%s4922_s0 + $0x320] sm:$0xff]   ;;  %v3898_v15 = vld [vmem:[%s4922_s0 + $0x330] sm:$0xff]  }
  0x1e   :  { %3530 = vmatmul.mubr.msk.bf16.gmra.mrb[8].mxu0 %vm944_vm0, %v3815_v12  ;;  %3662 = vmatmul.mubr.msk.bf16.gmra.mrb[8].mxu1 %vm944_vm0, %v3835_v18  ;;  %v3869_v12 = vld [vmem:[%s4922_s0 + $0x128] sm:$0xff]   ;;  %v3876_v18 = vld [vmem:[%s4922_s0 + $0x140] sm:$0xff]  }
  0x1f   :  { %3533 = vmatprep.mubr.msk.bf16.mxu0 %vm944_vm0, %v3816_v13  ;;  %3665 = vmatprep.mubr.msk.bf16.mxu1 %vm944_vm0, %v3838_v19  ;;  %v3895_v13 = vld [vmem:[%s4922_s0 + $0x328] sm:$0xff]   ;;  %v3902_v19 = vld [vmem:[%s4922_s0 + $0x340] sm:$0xff]  }
  0x26   :  { %3534 = vmatmul.mubr.msk.bf16.gmra.mrb[12].mxu0 %vm944_vm0, %v3817_v16  ;;  %3666 = vmatmul.mubr.msk.bf16.gmra.mrb[12].mxu1 %vm944_vm0, %v3839_v22  ;;  %v3873_v16 = vld [vmem:[%s4922_s0 + $0x138] sm:$0xff]   ;;  %v3880_v22 = vld [vmem:[%s4922_s0 + $0x150] sm:$0xff]  }
  0x27   :  { %3537 = vmatprep.mubr.msk.bf16.mxu0 %vm944_vm0, %v3818_v17  ;;  %3669 = vmatprep.mubr.msk.bf16.mxu1 %vm944_vm0, %v3842_v23  ;;  %v3899_v17 = vld [vmem:[%s4922_s0 + $0x338] sm:$0xff]   ;;  %v3906_v23 = vld [vmem:[%s4922_s0 + $0x350] sm:$0xff]  }
  0x2e   :  { %3538 = vmatmul.mubr.msk.bf16.gmra.mrb[16].mxu0 %vm944_vm0, %v3819_v20  ;;  %3670 = vmatmul.mubr.msk.bf16.gmra.mrb[16].mxu1 %vm944_vm0, %v3843_v26  ;;  %v3877_v20 = vld [vmem:[%s4922_s0 + $0x148] sm:$0xff]   ;;  %v3884_v26 = vld [vmem:[%s4922_s0 + $0x160] sm:$0xff]  }
  0x2f   :  { %3541 = vmatprep.mubr.msk.bf16.mxu0 %vm944_vm0, %v3820_v21  ;;  %3673 = vmatprep.mubr.msk.bf16.mxu1 %vm944_vm0, %v3846_v27  ;;  %v3903_v21 = vld [vmem:[%s4922_s0 + $0x348] sm:$0xff]   ;;  %v3910_v27 = vld [vmem:[%s4922_s0 + $0x360] sm:$0xff]  }
  0x36   :  { %3542 = vmatmul.mubr.msk.bf16.gmra.mrb[20].mxu0 %vm944_vm0, %v3821_v24  ;;  %3674 = vmatmul.mubr.msk.bf16.gmra.mrb[20].mxu1 %vm944_vm0, %v3847_v30  ;;  %v3881_v24 = vld [vmem:[%s4922_s0 + $0x158] sm:$0xff]   ;;  %v3888_v30 = vld [vmem:[%s4922_s0 + $0x170] sm:$0xff]  }
  0x37   :  { %3545 = vmatprep.mubr.msk.bf16.mxu0 %vm944_vm0, %v3822_v25  ;;  %3677 = vmatprep.mubr.msk.bf16.mxu1 %vm944_vm0, %v3850_v31  ;;  %v3907_v25 = vld [vmem:[%s4922_s0 + $0x358] sm:$0xff]   ;;  %v3914_v31 = vld [vmem:[%s4922_s0 + $0x370] sm:$0xff]  }
  0x3e   :  { %3546 = vmatmul.mubr.msk.bf16.gmra.mrb[24].mxu0 %vm944_vm0, %v3823_v28  ;;  %3678 = vmatmul.mubr.msk.bf16.gmra.mrb[24].mxu1 %vm944_vm0, %v3851_v34  ;;  %v3885_v28 = vld [vmem:[%s4922_s0 + $0x168] sm:$0xff]   ;;  %v3892_v34 = vld [vmem:[%s4922_s0 + $0x180] sm:$0xff]  }
  0x3f   :  { %3549 = vmatprep.mubr.msk.bf16.mxu0 %vm944_vm0, %v3824_v29  ;;  %3681 = vmatprep.mubr.msk.bf16.mxu1 %vm944_vm0, %v3854_v35  ;;  %v3911_v29 = vld [vmem:[%s4922_s0 + $0x368] sm:$0xff]   ;;  %v3918_v35 = vld [vmem:[%s4922_s0 + $0x380] sm:$0xff]  }
  0x46   :  { %3550 = vmatmul.mubr.msk.bf16.gmra.mrb[28].mxu0 %vm944_vm0, %v3825_v32  ;;  %3682 = vmatmul.mubr.msk.bf16.gmra.mrb[28].mxu1 %vm944_vm0, %v3855_v38  ;;  %v3889_v32 = vld [vmem:[%s4922_s0 + $0x178] sm:$0xff]   ;;  %v3896_v38 = vld [vmem:[%s4922_s0 + $0x190] sm:$0xff]  }
  0x47   :  { %3553 = vmatprep.mubr.msk.bf16.mxu0 %vm944_vm0, %v3828_v33  ;;  %3685 = vmatprep.mubr.msk.bf16.mxu1 %vm944_vm0, %v3858_v39  ;;  %v3915_v33 = vld [vmem:[%s4922_s0 + $0x378] sm:$0xff]   ;;  %v3922_v39 = vld [vmem:[%s4922_s0 + $0x390] sm:$0xff]  }
  0x4e   :  { %3554 = vmatmul.mubr.msk.bf16.gmra.mrb[32].mxu0 %vm944_vm0, %v3829_v36  ;;  %3686 = vmatmul.mubr.msk.bf16.gmra.mrb[32].mxu1 %vm944_vm0, %v3859_v42  ;;  %v3893_v36 = vld [vmem:[%s4922_s0 + $0x188] sm:$0xff]   ;;  %v3897_v42 = vld [vmem:[%s4922_s0 + $0x198] sm:$0xff]  }
  0x4f   :  { %3557 = vmatprep.mubr.msk.bf16.mxu0 %vm944_vm0, %v3832_v37  ;;  %3689 = vmatprep.mubr.msk.bf16.mxu1 %vm944_vm0, %v3862_v43  ;;  %v3919_v37 = vld [vmem:[%s4922_s0 + $0x388] sm:$0xff]   ;;  %v3923_v43 = vld [vmem:[%s4922_s0 + $0x398] sm:$0xff]  }
  0x56   :  { %3558 = vmatmul.mubr.msk.bf16.gmra.mrb[36].mxu0 %vm944_vm0, %v3833_v40  ;;  %3690 = vmatmul.mubr.msk.bf16.gmra.mrb[36].mxu1 %vm944_vm0, %v3863_v46  ;;  %v3948_v40 = vmov 0.0   ;;  %v3901_v46 = vld [vmem:[%s4922_s0 + $0x1a8] sm:$0xff]  }
  0x57   :  { %3561 = vmatprep.mubr.msk.bf16.mxu0 %vm944_vm0, %v3836_v41  ;;  %3693 = vmatprep.mubr.msk.bf16.mxu1 %vm944_vm0, %v3866_v47  ;;  %v3938_v41 = vld [vmem:[%s4923_s3] sm:$0xff]   ;;  %v3927_v47 = vld [vmem:[%s4922_s0 + $0x3a8] sm:$0xff]  }
  0x58   :  { %3777 = vmatprep.subr.bf16.mxu1 %v3948_v40 }
  0x59   :  { %3778 = vmatpush3.bf16.msra.mxu1 %v3938_v41 }
  0x5a   :  { %3779 = vmatprep.subr.bf16.mxu1 %v3948_v40 }
  0x5e   :  { %3562 = vmatmul.mubr.msk.bf16.gmra.mrb[40].mxu0 %vm944_vm0, %v3837_v44  ;;  %3694 = vmatmul.mubr.msk.bf16.gmra.mrb[40].mxu1 %vm944_vm0, %v3867_v50  ;;  %v3900_v44 = vld [vmem:[%s4922_s0 + $0x1a0] sm:$0xff]  }
  0x5f   :  { %3565 = vmatprep.mubr.msk.bf16.mxu0 %vm944_vm0, %v3840_v45  ;;  %3697 = vmatprep.mubr.msk.bf16.mxu1 %vm944_vm0, %v3870_v51  ;;  %v3926_v45 = vld [vmem:[%s4922_s0 + $0x3a0] sm:$0xff]  }
  0x60   :  { %v4429_v50 = vld [vmem:[%s4924_s2] ss:$0 sm:$0xff] }
  0x66   :  { %3566 = vmatmul.mubr.msk.bf16.gmra.mrb[44].mxu0 %vm944_vm0, %v3841_v48  ;;  %3698 = vmatmul.mubr.msk.bf16.gmra.mrb[44].mxu1 %vm944_vm0, %v3871_v54  ;;  %v3904_v48 = vld [vmem:[%s4922_s0 + $0x1b0] sm:$0xff]   ;;  %v3929_v54 = vld [vmem:[%s4922_s0 + $0x3b8] sm:$0xff]  }
  0x67   :  { %3569 = vmatprep.mubr.msk.bf16.mxu0 %vm944_vm0, %v3844_v49  ;;  %3701 = vmatprep.mubr.msk.bf16.mxu1 %vm944_vm0, %v3874_v55  ;;  %v3928_v49 = vld [vmem:[%s4922_s0 + $0x3b0] sm:$0xff]  }
  0x6e   :  { %3570 = vmatmul.mubr.msk.bf16.gmra.mrb[48].mxu0 %vm944_vm0, %v3845_v52  ;;  %3702 = vmatmul.mubr.msk.bf16.gmra.mrb[48].mxu1 %vm944_vm0, %v3875_v58  ;;  %v3930_v58 = vld [vmem:[%s4922_s0 + $0x3c0] sm:$0xff]  }
  0x6f   :  { %3573 = vmatprep.mubr.msk.bf16.mxu0 %vm944_vm0, %v3848_v53  ;;  %3705 = vmatprep.mubr.msk.bf16.mxu1 %vm944_vm0, %v3878_v59  ;;  %v3905_v53 = vld [vmem:[%s4922_s0 + $0x1b8] sm:$0xff]  }
  0x76   :  { %3574 = vmatmul.mubr.msk.bf16.gmra.mrb[52].mxu0 %vm944_vm0, %v3849_v56  ;;  %3706 = vmatmul.mubr.msk.bf16.gmra.mrb[52].mxu1 %vm944_vm0, %v3879_v62 }
  0x77   :  { %3577 = vmatprep.mubr.msk.bf16.mxu0 %vm944_vm0, %v3852_v57  ;;  %3709 = vmatprep.mubr.msk.bf16.mxu1 %vm944_vm0, %v3882_v63  ;;  %v3908_v57 = vld [vmem:[%s4922_s0 + $0x1c0] sm:$0xff]  }
  0x7e   :  { %3578 = vmatmul.mubr.msk.bf16.gmra.mrb[56].mxu0 %vm944_vm0, %v3853_v60  ;;  %3710 = vmatmul.mubr.msk.bf16.gmra.mrb[56].mxu1 %vm944_vm0, %v3883_v1 }
  0x7f   :  { %3581 = vmatprep.mubr.msk.bf16.mxu0 %vm944_vm0, %v3856_v61  ;;  %3713 = vmatprep.mubr.msk.bf16.mxu1 %vm944_vm0, %v3886_v3 }
  0x86   :  { %3582 = vmatmul.mubr.msk.bf16.gmra.mrb[60].mxu0 %vm944_vm0, %v3857_v0  ;;  %3714 = vmatmul.mubr.msk.bf16.gmra.mrb[60].mxu1 %vm944_vm0, %v3887_v5 }
  0x87   :  { %3585 = vmatprep.mubr.msk.bf16.mxu0 %vm944_vm0, %v3860_v2  ;;  %3717 = vmatprep.mubr.msk.bf16.mxu1 %vm944_vm0, %v3890_v7  ;;  %v3931_v7 = vld [vmem:[%s4922_s0 + $0x3c8] sm:$0xff]  }
  0x8e   :  { %3586 = vmatmul.mubr.msk.bf16.gmra.mrb[64].mxu0 %vm944_vm0, %v3861_v4  ;;  %3718 = vmatmul.mubr.msk.bf16.gmra.mrb[64].mxu1 %vm944_vm0, %v3891_v9 }
  0x8f   :  { %3589 = vmatprep.mubr.msk.bf16.mxu0 %vm944_vm0, %v3864_v6  ;;  %3721 = vmatprep.mubr.msk.bf16.mxu1 %vm944_vm0, %v3894_v11  ;;  %v3909_v6 = vld [vmem:[%s4922_s0 + $0x1c8] sm:$0xff]  }
  0x96   :  { %3590 = vmatmul.mubr.msk.bf16.gmra.mrb[68].mxu0 %vm944_vm0, %v3865_v8  ;;  %3722 = vmatmul.mubr.msk.bf16.gmra.mrb[68].mxu1 %vm944_vm0, %v3895_v13  ;;  %v3912_v13 = vld [vmem:[%s4922_s0 + $0x1d0] sm:$0xff]  }
  0x97   :  { %3593 = vmatprep.mubr.msk.bf16.mxu0 %vm944_vm0, %v3868_v10  ;;  %3725 = vmatprep.mubr.msk.bf16.mxu1 %vm944_vm0, %v3898_v15  ;;  %v3932_v15 = vld [vmem:[%s4922_s0 + $0x3d0] sm:$0xff]  }
  0x9e   :  { %3594 = vmatmul.mubr.msk.bf16.gmra.mrb[72].mxu0 %vm944_vm0, %v3869_v12  ;;  %3726 = vmatmul.mubr.msk.bf16.gmra.mrb[72].mxu1 %vm944_vm0, %v3899_v17 }
  0x9f   :  { %3597 = vmatprep.mubr.msk.bf16.mxu0 %vm944_vm0, %v3872_v14  ;;  %3729 = vmatprep.mubr.msk.bf16.mxu1 %vm944_vm0, %v3902_v19 }
  0xa6   :  { %3598 = vmatmul.mubr.msk.bf16.gmra.mrb[76].mxu0 %vm944_vm0, %v3873_v16  ;;  %3730 = vmatmul.mubr.msk.bf16.gmra.mrb[76].mxu1 %vm944_vm0, %v3903_v21 }
  0xa7   :  { %3601 = vmatprep.mubr.msk.bf16.mxu0 %vm944_vm0, %v3876_v18  ;;  %3733 = vmatprep.mubr.msk.bf16.mxu1 %vm944_vm0, %v3906_v23 }
  0xae   :  { %3602 = vmatmul.mubr.msk.bf16.gmra.mrb[80].mxu0 %vm944_vm0, %v3877_v20  ;;  %3734 = vmatmul.mubr.msk.bf16.gmra.mrb[80].mxu1 %vm944_vm0, %v3907_v25 }
  0xaf   :  { %3605 = vmatprep.mubr.msk.bf16.mxu0 %vm944_vm0, %v3880_v22  ;;  %3737 = vmatprep.mubr.msk.bf16.mxu1 %vm944_vm0, %v3910_v27 }
  0xb6   :  { %3606 = vmatmul.mubr.msk.bf16.gmra.mrb[84].mxu0 %vm944_vm0, %v3881_v24  ;;  %3738 = vmatmul.mubr.msk.bf16.gmra.mrb[84].mxu1 %vm944_vm0, %v3911_v29 }
  0xb7   :  { %3609 = vmatprep.mubr.msk.bf16.mxu0 %vm944_vm0, %v3884_v26  ;;  %3741 = vmatprep.mubr.msk.bf16.mxu1 %vm944_vm0, %v3914_v31  ;;  %v3933_v31 = vld [vmem:[%s4922_s0 + $0x3d8] sm:$0xff]  }
  0xbe   :  { %3610 = vmatmul.mubr.msk.bf16.gmra.mrb[88].mxu0 %vm944_vm0, %v3885_v28  ;;  %3742 = vmatmul.mubr.msk.bf16.gmra.mrb[88].mxu1 %vm944_vm0, %v3915_v33 }
  0xbf   :  { %3613 = vmatprep.mubr.msk.bf16.mxu0 %vm944_vm0, %v3888_v30  ;;  %3745 = vmatprep.mubr.msk.bf16.mxu1 %vm944_vm0, %v3918_v35  ;;  %v3913_v30 = vld [vmem:[%s4922_s0 + $0x1d8] sm:$0xff]  }
  0xc6   :  { %3614 = vmatmul.mubr.msk.bf16.gmra.mrb[92].mxu0 %vm944_vm0, %v3889_v32  ;;  %3746 = vmatmul.mubr.msk.bf16.gmra.mrb[92].mxu1 %vm944_vm0, %v3919_v37  ;;  %v3916_v37 = vld [vmem:[%s4922_s0 + $0x1e0] sm:$0xff]  }
  0xc7   :  { %3617 = vmatprep.mubr.msk.bf16.mxu0 %vm944_vm0, %v3892_v34  ;;  %3749 = vmatprep.mubr.msk.bf16.mxu1 %vm944_vm0, %v3922_v39  ;;  %v3934_v39 = vld [vmem:[%s4922_s0 + $0x3e0] sm:$0xff]  }
  0xce   :  { %3618 = vmatmul.mubr.msk.bf16.gmra.mrb[96].mxu0 %vm944_vm0, %v3893_v36  ;;  %3750 = vmatmul.mubr.msk.bf16.gmra.mrb[96].mxu1 %vm944_vm0, %v3923_v43 }
  0xcf   :  { %3621 = vmatprep.mubr.msk.bf16.mxu0 %vm944_vm0, %v3896_v38  ;;  %3753 = vmatprep.mubr.msk.bf16.mxu1 %vm944_vm0, %v3926_v45 }
  0xd6   :  { %3622 = vmatmul.mubr.msk.bf16.gmra.mrb[100].mxu0 %vm944_vm0, %v3897_v42  ;;  %3754 = vmatmul.mubr.msk.bf16.gmra.mrb[100].mxu1 %vm944_vm0, %v3927_v47 }
  0xd7   :  { %3625 = vmatprep.mubr.msk.bf16.mxu0 %vm944_vm0, %v3900_v44  ;;  %3757 = vmatprep.mubr.msk.bf16.mxu1 %vm944_vm0, %v3928_v49 }
  0xde   :  { %3626 = vmatmul.mubr.msk.bf16.gmra.mrb[104].mxu0 %vm944_vm0, %v3901_v46  ;;  %3758 = vmatmul.mubr.msk.bf16.gmra.mrb[104].mxu1 %vm944_vm0, %v3929_v54 }
  0xdf   :  { %3629 = vmatprep.mubr.msk.bf16.mxu0 %vm944_vm0, %v3904_v48  ;;  %3761 = vmatprep.mubr.msk.bf16.mxu1 %vm944_vm0, %v3930_v58  ;;  %v3935_v58 = vld [vmem:[%s4922_s0 + $0x3e8] sm:$0xff]  }
  0xe1   :  { %v3523_v51 = vpop.f32.mrb[0].mxu0  ;;  %v4451_v4 = vpop.f32.mrb[0].mxu1 }
  0xe2   :  { %v1367_v52 = vpop.f32.mrb[1].mxu0  ;;  %v1376_v60 = vadd.f32 %v3523_v51, %v4429_v50  ;;  %v4459_v8 = vpop.f32.mrb[1].mxu1 }
  0xe3   :  { %v1368_v55 = vadd.f32 %v4429_v50, %v1367_v52  ;;  %v3524_v56 = vpop.f32.mrb[2].mxu0  ;;  %v4465_v14 = vpop.f32.mrb[2].mxu1 }
  0xe4   :  { %v1370_v59 = vpop.f32.mrb[3].mxu0  ;;  %v1379_v63 = vadd.f32 %v3524_v56, %v4429_v50  ;;  %v2392_v1 = vmax.f32 %v1376_v60, 0.0  ;;  %v4470_v17 = vpop.f32.mrb[3].mxu1 }
  0xe5   :  { %v1371_v61 = vadd.f32 %v4429_v50, %v1370_v59  ;;  %v2390_v62 = vmax.f32 %v1368_v55, 0.0  ;;  %v3939_v55 = vld [vmem:[%s4923_s3 + $0x8] sm:$0xff]  }
  0xe6   :  { %3630 = vmatmul.mubr.msk.bf16.gmra.mrb[108].mxu0 %vm944_vm0, %v3905_v53  ;;  %v2393_v9 = vmax.f32 %v1379_v63, 0.0  ;;  %3762 = vmatmul.mubr.msk.bf16.gmra.mrb[108].mxu1 %vm944_vm0, %v3931_v7 }
  0xe7   :  { %v2391_v0 = vmax.f32 %v1371_v61, 0.0  ;;  %3633 = vmatprep.mubr.msk.bf16.mxu0 %vm944_vm0, %v3908_v57  ;;  %3765 = vmatprep.mubr.msk.bf16.mxu1 %vm944_vm0, %v3932_v15  ;;  %v3917_v57 = vld [vmem:[%s4922_s0 + $0x1e8] sm:$0xff]  }
  0xe8   :  { %3780 = vmatpush3.bf16.msra.mxu1 %v3939_v55 }
  0xe9   :  { %v2646_v2 = vadd.f32 %v2391_v0, %v2390_v62  ;;  %v3527_v3 = vpop.f32.mrb[4].mxu0  ;;  %v4479_v28 = vpop.f32.mrb[4].mxu1  ;;  %v3920_v0 = vld [vmem:[%s4922_s0 + $0x1f0] sm:$0xff]   ;;  %3781 = vmatprep.subr.bf16.mxu1 %v3948_v40 }
  0xea   :  { %v1383_v5 = vpop.f32.mrb[5].mxu0  ;;  %v1392_v18 = vadd.f32 %v3527_v3, %v4429_v50  ;;  %v4487_v32 = vpop.f32.mrb[5].mxu1 }
  0xeb   :  { %v2647_v10 = vadd.f32 %v2646_v2, %v2392_v1  ;;  %v1384_v11 = vadd.f32 %v4429_v50, %v1383_v5  ;;  %v3528_v12 = vpop.f32.mrb[6].mxu0  ;;  %v4493_v38 = vpop.f32.mrb[6].mxu1  ;;  %v3936_v2 = vld [vmem:[%s4922_s0 + $0x3f0] sm:$0xff]  }
  0xec   :  { %v1386_v16 = vpop.f32.mrb[7].mxu0  ;;  %v1395_v23 = vadd.f32 %v3528_v12, %v4429_v50  ;;  %v2396_v25 = vmax.f32 %v1392_v18, 0.0  ;;  %v4498_v42 = vpop.f32.mrb[7].mxu1 }
  0xed   :  { %v2394_v19 = vmax.f32 %v1384_v11, 0.0  ;;  %v2648_v20 = vadd.f32 %v2647_v10, %v2393_v9  ;;  %v1387_v21 = vadd.f32 %v4429_v50, %v1386_v16 }
  0xee   :  { %3634 = vmatmul.mubr.msk.bf16.gmra.mrb[112].mxu0 %vm944_vm0, %v3909_v6  ;;  %v2397_v33 = vmax.f32 %v1395_v23, 0.0  ;;  %3766 = vmatmul.mubr.msk.bf16.gmra.mrb[112].mxu1 %vm944_vm0, %v3933_v31 }
  0xef   :  { %v2649_v22 = vadd.f32 %v2648_v20, %v2394_v19  ;;  %v2395_v24 = vmax.f32 %v1387_v21, 0.0  ;;  %3637 = vmatprep.mubr.msk.bf16.mxu0 %vm944_vm0, %v3912_v13  ;;  %3769 = vmatprep.mubr.msk.bf16.mxu1 %vm944_vm0, %v3934_v39  ;;  %v3921_v21 = vld [vmem:[%s4922_s0 + $0x1f8] sm:$0xff]  }
  0xf1   :  { %v2650_v26 = vadd.f32 %v2649_v22, %v2395_v24  ;;  %v3531_v27 = vpop.f32.mrb[8].mxu0  ;;  %v4507_v54 = vpop.f32.mrb[8].mxu1  ;;  %v3937_v22 = vld [vmem:[%s4922_s0 + $0x3f8] sm:$0xff]  }
  0xf2   :  { %v1399_v29 = vpop.f32.mrb[9].mxu0  ;;  %v1408_v43 = vadd.f32 %v3531_v27, %v4429_v50  ;;  %v4518_v59 = vpop.f32.mrb[9].mxu1 }
  0xf3   :  { %v2651_v34 = vadd.f32 %v2650_v26, %v2396_v25  ;;  %v1400_v35 = vadd.f32 %v4429_v50, %v1399_v29  ;;  %v3532_v36 = vpop.f32.mrb[10].mxu0  ;;  %v4524_v1 = vpop.f32.mrb[10].mxu1  ;;  %v3924_v29 = vld [vmem:[%s4922_s0 + $0x200] sm:$0xff]  }
  0xf4   :  { %v1402_v41 = vpop.f32.mrb[11].mxu0  ;;  %v1411_v48 = vadd.f32 %v3532_v36, %v4429_v50  ;;  %v2400_v51 = vmax.f32 %v1408_v43, 0.0  ;;  %v4529_v5 = vpop.f32.mrb[11].mxu1 }
  0xf5   :  { %v2398_v44 = vmax.f32 %v1400_v35, 0.0  ;;  %v2652_v45 = vadd.f32 %v2651_v34, %v2397_v33  ;;  %v1403_v46 = vadd.f32 %v4429_v50, %v1402_v41 }
  0xf6   :  { %3638 = vmatmul.mubr.msk.bf16.gmra.mrb[116].mxu0 %vm944_vm0, %v3913_v30  ;;  %v2401_v60 = vmax.f32 %v1411_v48, 0.0  ;;  %3770 = vmatmul.mubr.msk.bf16.gmra.mrb[116].mxu1 %vm944_vm0, %v3935_v58  ;;  %v3940_v58 = vld [vmem:[%s4923_s3 + $0x10] sm:$0xff]  }
  0xf7   :  { %v2653_v47 = vadd.f32 %v2652_v45, %v2398_v44  ;;  %v2399_v49 = vmax.f32 %v1403_v46, 0.0  ;;  %3641 = vmatprep.mubr.msk.bf16.mxu0 %vm944_vm0, %v3916_v37  ;;  %3773 = vmatprep.mubr.msk.bf16.mxu1 %vm944_vm0, %v3936_v2 }
  0xf8   :  { %3782 = vmatpush3.bf16.msra.mxu1 %v3940_v58 }
  0xf9   :  { %v2654_v52 = vadd.f32 %v2653_v47, %v2399_v49  ;;  %v3535_v53 = vpop.f32.mrb[12].mxu0  ;;  %v4539_v19 = vpop.f32.mrb[12].mxu1  ;;  %v3925_v49 = vld [vmem:[%s4922_s0 + $0x208] sm:$0xff]   ;;  %3783 = vmatprep.subr.bf16.mxu1 %v3948_v40 }
  0xfa   :  { %v1415_v56 = vpop.f32.mrb[13].mxu0  ;;  %v1424_v6 = vadd.f32 %v3535_v53, %v4429_v50  ;;  %v4547_v23 = vpop.f32.mrb[13].mxu1 }
  0xfb   :  { %v2655_v61 = vadd.f32 %v2654_v52, %v2400_v51  ;;  %v1416_v62 = vadd.f32 %v4429_v50, %v1415_v56  ;;  %v3536_v63 = vpop.f32.mrb[14].mxu0  ;;  %v4553_v30 = vpop.f32.mrb[14].mxu1 }
  0xfc   :  { %v1418_v3 = vpop.f32.mrb[15].mxu0  ;;  %v1427_v12 = vadd.f32 %v3536_v63, %v4429_v50  ;;  %v2404_v15 = vmax.f32 %v1424_v6, 0.0  ;;  %v4555_v33 = vpop.f32.mrb[15].mxu1 }
  0xfd   :  { %v2402_v7 = vmax.f32 %v1416_v62, 0.0  ;;  %v2656_v9 = vadd.f32 %v2655_v61, %v2401_v60  ;;  %v1419_v10 = vadd.f32 %v4429_v50, %v1418_v3 }
  0xfe   :  { %3642 = vmatmul.mubr.msk.bf16.gmra.mrb[120].mxu0 %vm944_vm0, %v3917_v57  ;;  %v2405_v24 = vmax.f32 %v1427_v12, 0.0  ;;  %3774 = vmatmul.mubr.msk.bf16.gmra.mrb[120].mxu1 %vm944_vm0, %v3937_v22 }
  0xff   :  { %v2657_v11 = vadd.f32 %v2656_v9, %v2402_v7  ;;  %v2403_v13 = vmax.f32 %v1419_v10, 0.0  ;;  %3645 = vmatprep.mubr.msk.bf16.mxu0 %vm944_vm0, %v3920_v0  ;;  %3793 = vmatprep.mubr.msk.bf16.mxu1 %vm3949_vm3, %v3948_v40 }
 0x101   :  { %v2658_v16 = vadd.f32 %v2657_v11, %v2403_v13  ;;  %v3539_v18 = vpop.f32.mrb[16].mxu0  ;;  %v4563_v47 = vpop.f32.mrb[16].mxu1 }
 0x102   :  { %v1431_v20 = vpop.f32.mrb[17].mxu0  ;;  %v1440_v34 = vadd.f32 %v3539_v18, %v4429_v50  ;;  %v4568_v51 = vpop.f32.mrb[17].mxu1 }
 0x103   :  { %v2659_v25 = vadd.f32 %v2658_v16, %v2404_v15  ;;  %v1432_v26 = vadd.f32 %v4429_v50, %v1431_v20  ;;  %v3540_v27 = vpop.f32.mrb[18].mxu0  ;;  %v4571_v57 = vpop.f32.mrb[18].mxu1 }
 0x104   :  { %v1434_v31 = vpop.f32.mrb[19].mxu0  ;;  %v1443_v41 = vadd.f32 %v3540_v27, %v4429_v50  ;;  %v2408_v44 = vmax.f32 %v1440_v34, 0.0  ;;  %v4576_v61 = vpop.f32.mrb[19].mxu1 }
 0x105   :  { %v2406_v35 = vmax.f32 %v1432_v26, 0.0  ;;  %v2660_v36 = vadd.f32 %v2659_v25, %v2405_v24  ;;  %v1435_v37 = vadd.f32 %v4429_v50, %v1434_v31 }
 0x106   :  { %3646 = vmatmul.mubr.msk.bf16.gmra.mrb[124].mxu0 %vm944_vm0, %v3921_v21  ;;  %v2409_v52 = vmax.f32 %v1443_v41, 0.0 }
 0x107   :  { %v2661_v39 = vadd.f32 %v2660_v36, %v2406_v35  ;;  %v2407_v43 = vmax.f32 %v1435_v37, 0.0  ;;  %3649 = vmatprep.mubr.msk.bf16.mxu0 %vm944_vm0, %v3924_v29 }
 0x109   :  { %v2662_v45 = vadd.f32 %v2661_v39, %v2407_v43  ;;  %v3543_v46 = vpop.f32.mrb[20].mxu0  ;;  %v4583_v12 = vpop.f32.mrb[20].mxu1 }
 0x10a   :  { %v1447_v48 = vpop.f32.mrb[21].mxu0  ;;  %v1456_v62 = vadd.f32 %v3543_v46, %v4429_v50  ;;  %v4585_v15 = vpop.f32.mrb[21].mxu1 }
 0x10b   :  { %v2663_v53 = vadd.f32 %v2662_v45, %v2408_v44  ;;  %v1448_v55 = vadd.f32 %v4429_v50, %v1447_v48  ;;  %v3544_v56 = vpop.f32.mrb[22].mxu0  ;;  %v4588_v22 = vpop.f32.mrb[22].mxu1 }
 0x10c   :  { %v1450_v60 = vpop.f32.mrb[23].mxu0  ;;  %v1459_v6 = vadd.f32 %v3544_v56, %v4429_v50  ;;  %v2412_v9 = vmax.f32 %v1456_v62, 0.0  ;;  %v4590_v25 = vpop.f32.mrb[23].mxu1 }
 0x10d   :  { %v2410_v63 = vmax.f32 %v1448_v55, 0.0  ;;  %v2664_v0 = vadd.f32 %v2663_v53, %v2409_v52  ;;  %v1451_v2 = vadd.f32 %v4429_v50, %v1450_v60 }
 0x10e   :  { %3650 = vmatmul.mubr.msk.bf16.gmra.mrb[128].mxu0 %vm944_vm0, %v3925_v49  ;;  %v2413_v16 = vmax.f32 %v1459_v6, 0.0 }
 0x10f   :  { %v2665_v3 = vadd.f32 %v2664_v0, %v2410_v63  ;;  %v2411_v7 = vmax.f32 %v1451_v2, 0.0 }
 0x111   :  { %v2666_v10 = vadd.f32 %v2665_v3, %v2411_v7  ;;  %v3547_v11 = vpop.f32.mrb[24].mxu0  ;;  %v4595_v43 = vpop.f32.mrb[24].mxu1 }
 0x112   :  { %v1463_v13 = vpop.f32.mrb[25].mxu0  ;;  %v1472_v26 = vadd.f32 %v3547_v11, %v4429_v50  ;;  %v4597_v45 = vpop.f32.mrb[25].mxu1 }
 0x113   :  { %v2667_v18 = vadd.f32 %v2666_v10, %v2412_v9  ;;  %v1464_v20 = vadd.f32 %v4429_v50, %v1463_v13  ;;  %v3548_v21 = vpop.f32.mrb[26].mxu0  ;;  %v4600_v53 = vpop.f32.mrb[26].mxu1 }
 0x114   :  { %v1466_v24 = vpop.f32.mrb[27].mxu0  ;;  %v1475_v35 = vadd.f32 %v3548_v21, %v4429_v50  ;;  %v2416_v37 = vmax.f32 %v1472_v26, 0.0  ;;  %v4602_v56 = vpop.f32.mrb[27].mxu1 }
 0x115   :  { %v2414_v27 = vmax.f32 %v1464_v20, 0.0  ;;  %v2668_v29 = vadd.f32 %v2667_v18, %v2413_v16  ;;  %v1467_v31 = vadd.f32 %v4429_v50, %v1466_v24 }
 0x116   :  { %v2417_v46 = vmax.f32 %v1475_v35, 0.0 }
 0x117   :  { %v2669_v34 = vadd.f32 %v2668_v29, %v2414_v27  ;;  %v2415_v36 = vmax.f32 %v1467_v31, 0.0 }
 0x119   :  { %v2670_v39 = vadd.f32 %v2669_v34, %v2415_v36  ;;  %v3551_v41 = vpop.f32.mrb[28].mxu0  ;;  %v3683_v10 = vpop.f32.mrb[28].mxu1 }
 0x11a   :  { %v1479_v44 = vpop.f32.mrb[29].mxu0  ;;  %v1488_v58 = vadd.f32 %v3551_v41, %v4429_v50  ;;  %v2007_v13 = vpop.f32.mrb[29].mxu1  ;;  %v2016_v29 = vadd.f32 %v3683_v10, %v4429_v50 }
 0x11b   :  { %v2671_v48 = vadd.f32 %v2670_v39, %v2416_v37  ;;  %v1480_v49 = vadd.f32 %v4429_v50, %v1479_v44  ;;  %v3552_v52 = vpop.f32.mrb[30].mxu0  ;;  %v2008_v24 = vadd.f32 %v4429_v50, %v2007_v13  ;;  %v3684_v26 = vpop.f32.mrb[30].mxu1 }
 0x11c   :  { %v1482_v55 = vpop.f32.mrb[31].mxu0  ;;  %v1491_v2 = vadd.f32 %v3552_v52, %v4429_v50  ;;  %v2420_v6 = vmax.f32 %v1488_v58, 0.0  ;;  %v2010_v31 = vpop.f32.mrb[31].mxu1  ;;  %v2019_v39 = vadd.f32 %v3684_v26, %v4429_v50 }
 0x11d   :  { %v2418_v60 = vmax.f32 %v1480_v49, 0.0  ;;  %v2672_v62 = vadd.f32 %v2671_v48, %v2417_v46  ;;  %v1483_v63 = vadd.f32 %v4429_v50, %v1482_v55  ;;  %v2550_v37 = vmax.f32 %v2008_v24, 0.0 }
 0x11e   :  { %v2421_v16 = vmax.f32 %v1491_v2, 0.0  ;;  %v2011_v41 = vadd.f32 %v4429_v50, %v2010_v31  ;;  %v2552_v49 = vmax.f32 %v2016_v29, 0.0 }
 0x11f   :  { %v2673_v0 = vadd.f32 %v2672_v62, %v2418_v60  ;;  %v2419_v3 = vmax.f32 %v1483_v63, 0.0 }
 0x120   :  { %v2551_v52 = vmax.f32 %v2011_v41, 0.0 }
 0x121   :  { %v2674_v7 = vadd.f32 %v2673_v0, %v2419_v3  ;;  %v3555_v9 = vpop.f32.mrb[32].mxu0  ;;  %v3687_v62 = vpop.f32.mrb[32].mxu1  ;;  %v2553_v0 = vmax.f32 %v2019_v39, 0.0 }
 0x122   :  { %v1495_v11 = vpop.f32.mrb[33].mxu0  ;;  %v1504_v35 = vadd.f32 %v3555_v9, %v4429_v50  ;;  %v2831_v2 = vadd.f32 %v2551_v52, %v2550_v37  ;;  %v2023_v3 = vpop.f32.mrb[33].mxu1  ;;  %v2032_v29 = vadd.f32 %v3687_v62, %v4429_v50 }
 0x123   :  { %v2675_v18 = vadd.f32 %v2674_v7, %v2420_v6  ;;  %v1496_v20 = vadd.f32 %v4429_v50, %v1495_v11  ;;  %v3556_v21 = vpop.f32.mrb[34].mxu0  ;;  %v2024_v11 = vadd.f32 %v4429_v50, %v2023_v3  ;;  %v3688_v13 = vpop.f32.mrb[34].mxu1 }
 0x124   :  { %v1498_v27 = vpop.f32.mrb[35].mxu0  ;;  %v1507_v46 = vadd.f32 %v3556_v21, %v4429_v50  ;;  %v2424_v55 = vmax.f32 %v1504_v35, 0.0 }
 0x125   :  { %v4610_v34 = vadd.f32 %v2675_v18, %v2421_v16  ;;  %v1499_v36 = vadd.f32 %v4429_v50, %v1498_v27  ;;  %v2422_v44 = vmax.f32 %v1496_v20, 0.0  ;;  %v2832_v18 = vadd.f32 %v2831_v2, %v2552_v49  ;;  %v2026_v20 = vpop.f32.mrb[35].mxu1 }
 0x126   :  { %v2425_v6 = vmax.f32 %v1507_v46, 0.0  ;;  %v2554_v31 = vmax.f32 %v2024_v11, 0.0  ;;  %v2027_v41 = vadd.f32 %v4429_v50, %v2026_v20  ;;  %v2035_v46 = vadd.f32 %v3688_v13, %v4429_v50 }
 0x127   :  { %v2423_v48 = vmax.f32 %v1499_v36, 0.0  ;;  %v2833_v35 = vadd.f32 %v2832_v18, %v2553_v0 }
 0x128   :  { %v2557_v11 = vmax.f32 %v2035_v46, 0.0 }
 0x129   :  { %v2683_v58 = vadd.f32 %v2423_v48, %v2422_v44  ;;  %v3559_v60 = vpop.f32.mrb[36].mxu0  ;;  %v2834_v44 = vadd.f32 %v2833_v35, %v2554_v31 }
 0x12a   :  { %v1511_v63 = vpop.f32.mrb[37].mxu0  ;;  %v1520_v21 = vadd.f32 %v3559_v60, %v4429_v50 }
 0x12b   :  { %v2684_v7 = vadd.f32 %v2683_v58, %v2424_v55  ;;  %v1512_v9 = vadd.f32 %v4429_v50, %v1511_v63  ;;  %v3560_v10 = vpop.f32.mrb[38].mxu0  ;;  %v2555_v55 = vmax.f32 %v2027_v41, 0.0  ;;  %v3691_v58 = vpop.f32.mrb[36].mxu1  ;;  %v2556_v63 = vmax.f32 %v2032_v29, 0.0 }
 0x12c   :  { %v1514_v16 = vpop.f32.mrb[39].mxu0  ;;  %v1523_v37 = vadd.f32 %v3560_v10, %v4429_v50  ;;  %v2428_v48 = vmax.f32 %v1520_v21, 0.0  ;;  %v2039_v2 = vpop.f32.mrb[37].mxu1 }
 0x12d   :  { %v2426_v24 = vmax.f32 %v1512_v9, 0.0  ;;  %v2685_v26 = vadd.f32 %v2684_v7, %v2425_v6  ;;  %v1515_v27 = vadd.f32 %v4429_v50, %v1514_v16  ;;  %v2835_v7 = vadd.f32 %v2834_v44, %v2555_v55  ;;  %v3692_v9 = vpop.f32.mrb[38].mxu1  ;;  %v3941_v55 = vld [vmem:[%s4923_s3 + $0x18] sm:$0xff]  }
 0x12e   :  { %v2429_v62 = vmax.f32 %v1523_v37, 0.0  ;;  %v2040_v16 = vadd.f32 %v4429_v50, %v2039_v2  ;;  %v2042_v13 = vpop.f32.mrb[39].mxu1  ;;  %v2051_v41 = vadd.f32 %v3692_v9, %v4429_v50  ;;  %3784 = vmatpush3.bf16.msra.mxu1 %v3941_v55 }
 0x12f   :  { %v2686_v36 = vadd.f32 %v2685_v26, %v2426_v24  ;;  %v2427_v39 = vmax.f32 %v1515_v27, 0.0  ;;  %v2836_v26 = vadd.f32 %v2835_v7, %v2556_v63  ;;  %v2048_v27 = vadd.f32 %v3691_v58, %v4429_v50  ;;  %3785 = vmatprep.subr.bf16.mxu1 %v3948_v40 }
 0x130   :  { %v2558_v29 = vmax.f32 %v2040_v16, 0.0  ;;  %v2043_v37 = vadd.f32 %v4429_v50, %v2042_v13 }
 0x131   :  { %v2687_v49 = vadd.f32 %v2686_v36, %v2427_v39  ;;  %v3563_v52 = vpop.f32.mrb[40].mxu0  ;;  %v2837_v39 = vadd.f32 %v2836_v26, %v2557_v11  ;;  %v2561_v11 = vmax.f32 %v2051_v41, 0.0 }
 0x132   :  { %v1527_v60 = vpop.f32.mrb[41].mxu0  ;;  %v1536_v18 = vadd.f32 %v3563_v52, %v4429_v50  ;;  %v3695_v52 = vpop.f32.mrb[40].mxu1 }
 0x133   :  { %v2688_v3 = vadd.f32 %v2687_v49, %v2428_v48  ;;  %v1528_v0 = vadd.f32 %v4429_v50, %v1527_v60  ;;  %v3564_v6 = vpop.f32.mrb[42].mxu0  ;;  %v2559_v49 = vmax.f32 %v2043_v37, 0.0  ;;  %v2560_v60 = vmax.f32 %v2048_v27, 0.0  ;;  %v2055_v2 = vpop.f32.mrb[41].mxu1 }
 0x134   :  { %v1530_v10 = vpop.f32.mrb[43].mxu0  ;;  %v1539_v35 = vadd.f32 %v3564_v6, %v4429_v50  ;;  %v2432_v44 = vmax.f32 %v1536_v18, 0.0  ;;  %v2838_v63 = vadd.f32 %v2837_v39, %v2558_v29  ;;  %v2056_v7 = vadd.f32 %v4429_v50, %v2055_v2  ;;  %v3696_v9 = vpop.f32.mrb[42].mxu1 }
 0x135   :  { %v2430_v20 = vmax.f32 %v1528_v0, 0.0  ;;  %v2689_v21 = vadd.f32 %v2688_v3, %v2429_v62  ;;  %v1531_v24 = vadd.f32 %v4429_v50, %v1530_v10  ;;  %v2058_v13 = vpop.f32.mrb[43].mxu1  ;;  %v2064_v27 = vadd.f32 %v3695_v52, %v4429_v50 }
 0x136   :  { %v2433_v62 = vmax.f32 %v1539_v35, 0.0  ;;  %v2839_v16 = vadd.f32 %v2838_v63, %v2559_v49  ;;  %v2562_v29 = vmax.f32 %v2056_v7, 0.0  ;;  %v2067_v41 = vadd.f32 %v3696_v9, %v4429_v50 }
 0x137   :  { %v2690_v31 = vadd.f32 %v2689_v21, %v2430_v20  ;;  %v2431_v36 = vmax.f32 %v1531_v24, 0.0  ;;  %v2564_v63 = vmax.f32 %v2064_v27, 0.0 }
 0x138   :  { %v2840_v26 = vadd.f32 %v2839_v16, %v2560_v60 }
 0x139   :  { %v2691_v46 = vadd.f32 %v2690_v31, %v2431_v36  ;;  %v3567_v48 = vpop.f32.mrb[44].mxu0  ;;  %v2059_v31 = vadd.f32 %v4429_v50, %v2058_v13  ;;  %v3699_v55 = vpop.f32.mrb[44].mxu1 }
 0x13a   :  { %v1543_v58 = vpop.f32.mrb[45].mxu0  ;;  %v1552_v18 = vadd.f32 %v3567_v48, %v4429_v50  ;;  %v2841_v39 = vadd.f32 %v2840_v26, %v2561_v11  ;;  %v2071_v2 = vpop.f32.mrb[45].mxu1  ;;  %v2565_v11 = vmax.f32 %v2067_v41, 0.0  ;;  %v2080_v26 = vadd.f32 %v3699_v55, %v4429_v50 }
 0x13b   :  { %v2692_v3 = vadd.f32 %v2691_v46, %v2432_v44  ;;  %v1544_v0 = vadd.f32 %v4429_v50, %v1543_v58  ;;  %v3568_v6 = vpop.f32.mrb[46].mxu0  ;;  %v2563_v44 = vmax.f32 %v2059_v31, 0.0  ;;  %v3700_v7 = vpop.f32.mrb[46].mxu1 }
 0x13c   :  { %v1546_v10 = vpop.f32.mrb[47].mxu0  ;;  %v1555_v36 = vadd.f32 %v3568_v6, %v4429_v50  ;;  %v2436_v46 = vmax.f32 %v1552_v18, 0.0  ;;  %v2842_v60 = vadd.f32 %v2841_v39, %v2562_v29  ;;  %v2072_v6 = vadd.f32 %v4429_v50, %v2071_v2  ;;  %v2074_v16 = vpop.f32.mrb[47].mxu1 }
 0x13d   :  { %v2434_v20 = vmax.f32 %v1544_v0, 0.0  ;;  %v2693_v21 = vadd.f32 %v2692_v3, %v2433_v62  ;;  %v1547_v24 = vadd.f32 %v4429_v50, %v1546_v10  ;;  %v2075_v29 = vadd.f32 %v4429_v50, %v2074_v16 }
 0x13e   :  { %v2437_v52 = vmax.f32 %v1555_v36, 0.0  ;;  %v2843_v9 = vadd.f32 %v2842_v60, %v2563_v44  ;;  %v2566_v27 = vmax.f32 %v2072_v6, 0.0  ;;  %v2083_v41 = vadd.f32 %v3700_v7, %v4429_v50 }
 0x13f   :  { %v2694_v35 = vadd.f32 %v2693_v21, %v2434_v20  ;;  %v2435_v37 = vmax.f32 %v1547_v24, 0.0  ;;  %v2567_v44 = vmax.f32 %v2075_v29, 0.0 }
 0x140   :  { %v2844_v24 = vadd.f32 %v2843_v9, %v2564_v63  ;;  %v2568_v63 = vmax.f32 %v2080_v26, 0.0 }
 0x141   :  { %v2695_v48 = vadd.f32 %v2694_v35, %v2435_v37  ;;  %v3571_v49 = vpop.f32.mrb[48].mxu0  ;;  %v3942_v37 = vld [vmem:[%s4923_s3 + $0x20] sm:$0xff]  }
 0x142   :  { %v1559_v58 = vpop.f32.mrb[49].mxu0  ;;  %v1568_v13 = vadd.f32 %v3571_v49, %v4429_v50  ;;  %v2845_v39 = vadd.f32 %v2844_v24, %v2565_v11  ;;  %3786 = vmatpush3.bf16.msra.mxu1 %v3942_v37  ;;  %v2569_v11 = vmax.f32 %v2083_v41, 0.0 }
 0x143   :  { %v2696_v62 = vadd.f32 %v2695_v48, %v2436_v46  ;;  %v1560_v3 = vadd.f32 %v4429_v50, %v1559_v58  ;;  %v3572_v0 = vpop.f32.mrb[50].mxu0  ;;  %v3703_v58 = vpop.f32.mrb[48].mxu1  ;;  %3787 = vmatprep.subr.bf16.mxu1 %v3948_v40 }
 0x144   :  { %v1562_v10 = vpop.f32.mrb[51].mxu0  ;;  %v1571_v35 = vadd.f32 %v3572_v0, %v4429_v50  ;;  %v2440_v46 = vmax.f32 %v1568_v13, 0.0  ;;  %v2846_v60 = vadd.f32 %v2845_v39, %v2566_v27  ;;  %v2087_v2 = vpop.f32.mrb[49].mxu1  ;;  %v2096_v26 = vadd.f32 %v3703_v58, %v4429_v50 }
 0x145   :  { %v2438_v18 = vmax.f32 %v1560_v3, 0.0  ;;  %v2697_v20 = vadd.f32 %v2696_v62, %v2437_v52  ;;  %v1563_v21 = vadd.f32 %v4429_v50, %v1562_v10  ;;  %v2088_v6 = vadd.f32 %v4429_v50, %v2087_v2  ;;  %v3704_v7 = vpop.f32.mrb[50].mxu1 }
 0x146   :  { %v2441_v52 = vmax.f32 %v1571_v35, 0.0  ;;  %v2847_v9 = vadd.f32 %v2846_v60, %v2567_v44  ;;  %v2090_v16 = vpop.f32.mrb[51].mxu1  ;;  %v2099_v39 = vadd.f32 %v3704_v7, %v4429_v50  ;;  %v2572_v60 = vmax.f32 %v2096_v26, 0.0 }
 0x147   :  { %v2698_v31 = vadd.f32 %v2697_v20, %v2438_v18  ;;  %v2439_v36 = vmax.f32 %v1563_v21, 0.0  ;;  %v2570_v27 = vmax.f32 %v2088_v6, 0.0  ;;  %v2091_v29 = vadd.f32 %v4429_v50, %v2090_v16 }
 0x148   :  { %v2848_v24 = vadd.f32 %v2847_v9, %v2568_v63 }
 0x149   :  { %v2699_v48 = vadd.f32 %v2698_v31, %v2439_v36  ;;  %v3575_v49 = vpop.f32.mrb[52].mxu0  ;;  %v2571_v41 = vmax.f32 %v2091_v29, 0.0 }
 0x14a   :  { %v1575_v55 = vpop.f32.mrb[53].mxu0  ;;  %v1584_v13 = vadd.f32 %v3575_v49, %v4429_v50  ;;  %v2849_v37 = vadd.f32 %v2848_v24, %v2569_v11  ;;  %v3707_v49 = vpop.f32.mrb[52].mxu1  ;;  %v2573_v11 = vmax.f32 %v2099_v39, 0.0 }
 0x14b   :  { %v2700_v62 = vadd.f32 %v2699_v48, %v2440_v46  ;;  %v1576_v3 = vadd.f32 %v4429_v50, %v1575_v55  ;;  %v3576_v0 = vpop.f32.mrb[54].mxu0  ;;  %v2103_v2 = vpop.f32.mrb[53].mxu1  ;;  %v2112_v26 = vadd.f32 %v3707_v49, %v4429_v50 }
 0x14c   :  { %v1578_v10 = vpop.f32.mrb[55].mxu0  ;;  %v1587_v35 = vadd.f32 %v3576_v0, %v4429_v50  ;;  %v2444_v44 = vmax.f32 %v1584_v13, 0.0  ;;  %v2850_v63 = vadd.f32 %v2849_v37, %v2570_v27  ;;  %v2104_v0 = vadd.f32 %v4429_v50, %v2103_v2  ;;  %v3708_v6 = vpop.f32.mrb[54].mxu1 }
 0x14d   :  { %v2442_v18 = vmax.f32 %v1576_v3, 0.0  ;;  %v2701_v20 = vadd.f32 %v2700_v62, %v2441_v52  ;;  %v1579_v21 = vadd.f32 %v4429_v50, %v1578_v10  ;;  %v2677_v10 = vrot.slane %v4610_v34, 4  ;;  %v2106_v16 = vpop.f32.mrb[55].mxu1 }
 0x14e   :  { %v2445_v58 = vmax.f32 %v1587_v35, 0.0  ;;  %v2851_v9 = vadd.f32 %v2850_v63, %v2571_v41  ;;  %v2574_v27 = vmax.f32 %v2104_v0, 0.0  ;;  %v2107_v29 = vadd.f32 %v4429_v50, %v2106_v16 }
 0x14f   :  { %v2702_v31 = vadd.f32 %v2701_v20, %v2442_v18  ;;  %v2443_v36 = vmax.f32 %v1579_v21, 0.0  ;;  %v2678_v37 = vadd.f32 %v2677_v10, %v4610_v34  ;;  %v2115_v41 = vadd.f32 %v3708_v6, %v4429_v50 }
 0x150   :  { %v2852_v24 = vadd.f32 %v2851_v9, %v2572_v60  ;;  %v2576_v2 = vmax.f32 %v2112_v26, 0.0 }
 0x151   :  { %v2703_v46 = vadd.f32 %v2702_v31, %v2443_v36  ;;  %v3579_v48 = vpop.f32.mrb[56].mxu0  ;;  %v3711_v63 = vpop.f32.mrb[56].mxu1  ;;  %v2679_v10 = vrot.slane %v2678_v37, 2  ;;  %v2577_v6 = vmax.f32 %v2115_v41, 0.0 }
 0x152   :  { %v1591_v55 = vpop.f32.mrb[57].mxu0  ;;  %v1600_v13 = vadd.f32 %v3579_v48, %v4429_v50  ;;  %v2853_v39 = vadd.f32 %v2852_v24, %v2573_v11  ;;  %v2128_v26 = vadd.f32 %v3711_v63, %v4429_v50 }
 0x153   :  { %v2704_v52 = vadd.f32 %v2703_v46, %v2444_v44  ;;  %v1592_v62 = vadd.f32 %v4429_v50, %v1591_v55  ;;  %v3580_v3 = vpop.f32.mrb[58].mxu0  ;;  %v2575_v44 = vmax.f32 %v2107_v29, 0.0 }
 0x154   :  { %v1594_v7 = vpop.f32.mrb[59].mxu0  ;;  %v1603_v35 = vadd.f32 %v3580_v3, %v4429_v50  ;;  %v2448_v46 = vmax.f32 %v1600_v13, 0.0  ;;  %v2854_v49 = vadd.f32 %v2853_v39, %v2574_v27  ;;  %v2680_v39 = vadd.f32 %v2679_v10, %v2678_v37 }
 0x155   :  { %v2446_v18 = vmax.f32 %v1592_v62, 0.0  ;;  %v2705_v20 = vadd.f32 %v2704_v52, %v2445_v58  ;;  %v1595_v21 = vadd.f32 %v4429_v50, %v1594_v7  ;;  %v2119_v58 = vpop.f32.mrb[57].mxu1 }
 0x156   :  { %v2449_v52 = vmax.f32 %v1603_v35, 0.0  ;;  %v2120_v7 = vadd.f32 %v4429_v50, %v2119_v58  ;;  %v3712_v34 = vpop.f32.mrb[58].mxu1  ;;  %v2855_v9 = vadd.f32 %v2854_v49, %v2575_v44  ;;  %v2681_v10 = vrot.slane %v2680_v39, 1 }
 0x157   :  { %v2706_v31 = vadd.f32 %v2705_v20, %v2446_v18  ;;  %v2447_v36 = vmax.f32 %v1595_v21, 0.0  ;;  %v2122_v16 = vpop.f32.mrb[59].mxu1  ;;  %v2131_v44 = vadd.f32 %v3712_v34, %v4429_v50 }
 0x158   :  { %v2856_v24 = vadd.f32 %v2855_v9, %v2576_v2  ;;  %v2578_v27 = vmax.f32 %v2120_v7, 0.0  ;;  %v2123_v29 = vadd.f32 %v4429_v50, %v2122_v16  ;;  %v2580_v2 = vmax.f32 %v2128_v26, 0.0 }
 0x159   :  { %v2707_v48 = vadd.f32 %v2706_v31, %v2447_v36  ;;  %v3583_v55 = vpop.f32.mrb[60].mxu0  ;;  %v3715_v49 = vpop.f32.mrb[60].mxu1  ;;  %v2581_v34 = vmax.f32 %v2131_v44, 0.0 }
 0x15a   :  { %v1607_v60 = vpop.f32.mrb[61].mxu0  ;;  %v1616_v13 = vadd.f32 %v3583_v55, %v4429_v50  ;;  %v2857_v41 = vadd.f32 %v2856_v24, %v2577_v6  ;;  %v2135_v63 = vpop.f32.mrb[61].mxu1  ;;  %v2144_v16 = vadd.f32 %v3715_v49, %v4429_v50 }
 0x15b   :  { %v2708_v62 = vadd.f32 %v2707_v48, %v2448_v46  ;;  %v1608_v0 = vadd.f32 %v4429_v50, %v1607_v60  ;;  %v3584_v3 = vpop.f32.mrb[62].mxu0  ;;  %v2579_v46 = vmax.f32 %v2123_v29, 0.0  ;;  %v3716_v37 = vpop.f32.mrb[62].mxu1 }
 0x15c   :  { %v1610_v11 = vpop.f32.mrb[63].mxu0  ;;  %v1619_v35 = vadd.f32 %v3584_v3, %v4429_v50  ;;  %v2452_v48 = vmax.f32 %v1616_v13, 0.0  ;;  %v2136_v3 = vadd.f32 %v4429_v50, %v2135_v63  ;;  %v2138_v13 = vpop.f32.mrb[63].mxu1  ;;  %v2147_v29 = vadd.f32 %v3716_v37, %v4429_v50 }
 0x15d   :  { %v2450_v18 = vmax.f32 %v1608_v0, 0.0  ;;  %v2709_v20 = vadd.f32 %v2708_v62, %v2449_v52  ;;  %v1611_v21 = vadd.f32 %v4429_v50, %v1610_v11  ;;  %v2858_v52 = vadd.f32 %v2857_v41, %v2578_v27 }
 0x15e   :  { %v2453_v62 = vmax.f32 %v1619_v35, 0.0  ;;  %v2582_v27 = vmax.f32 %v2136_v3, 0.0  ;;  %v2682_v63 = vadd.f32 %v2681_v10, %v2680_v39 }
 0x15f   :  { %v2710_v31 = vadd.f32 %v2709_v20, %v2450_v18  ;;  %v2451_v36 = vmax.f32 %v1611_v21, 0.0  ;;  %v2859_v9 = vadd.f32 %v2858_v52, %v2579_v46  ;;  %v2584_v46 = vmax.f32 %v2144_v16, 0.0 }
 0x161   :  { %v2711_v55 = vadd.f32 %v2710_v31, %v2451_v36  ;;  %v3587_v60 = vpop.f32.mrb[64].mxu0  ;;  %v2860_v26 = vadd.f32 %v2859_v9, %v2580_v2  ;;  %v2139_v31 = vadd.f32 %v4429_v50, %v2138_v13  ;;  %v3719_v52 = vpop.f32.mrb[64].mxu1 }
 0x162   :  { %v1623_v58 = vpop.f32.mrb[65].mxu0  ;;  %v1632_v20 = vadd.f32 %v3587_v60, %v4429_v50  ;;  %v2151_v3 = vpop.f32.mrb[65].mxu1 }
 0x163   :  { %v2712_v0 = vadd.f32 %v2711_v55, %v2452_v48  ;;  %v1624_v7 = vadd.f32 %v4429_v50, %v1623_v58  ;;  %v3588_v11 = vpop.f32.mrb[66].mxu0  ;;  %v4691_v44 = vadd.f32 %v2860_v26, %v2581_v34  ;;  %v2583_v48 = vmax.f32 %v2139_v31, 0.0  ;;  %v3720_v16 = vpop.f32.mrb[66].mxu1 }
 0x164   :  { %v1626_v6 = vpop.f32.mrb[67].mxu0  ;;  %v1635_v21 = vadd.f32 %v3588_v11, %v4429_v50  ;;  %v2456_v49 = vmax.f32 %v1632_v20, 0.0  ;;  %v2152_v34 = vadd.f32 %v4429_v50, %v2151_v3 }
 0x165   :  { %v2713_v18 = vadd.f32 %v2712_v0, %v2453_v62  ;;  %v1627_v24 = vadd.f32 %v4429_v50, %v1626_v6  ;;  %v2454_v36 = vmax.f32 %v1624_v7, 0.0  ;;  %v2585_v0 = vmax.f32 %v2147_v29, 0.0 }
 0x166   :  { %v2457_v62 = vmax.f32 %v1635_v21, 0.0  ;;  %v2868_v11 = vadd.f32 %v2583_v48, %v2582_v27  ;;  %v4699_v21 = vld [vmem:[%s4924_s2] ss:$0 sm:$0xff]  ;;  %v2942_v29 = vmul.f32 0.00390625, %v2682_v63 }
 0x167   :  { %v2714_v35 = vrot.slane %v2713_v18, 4  ;;  %v2455_v41 = vmax.f32 %v1627_v24, 0.0  ;;  %v2154_v24 = vpop.f32.mrb[67].mxu1 }
 0x168   :  { %v2869_v20 = vadd.f32 %v2868_v11, %v2584_v46  ;;  %v2950_v63 = vpack.c.bf16 %v2942_v29, %v2942_v29 }
 0x169   :  { %v2715_v55 = vadd.f32 %v2714_v35, %v2713_v18  ;;  %v2720_v60 = vadd.f32 %v2455_v41, %v2454_v36  ;;  %v3591_v58 = vpop.f32.mrb[68].mxu0  ;;  %v2160_v35 = vadd.f32 %v4699_v21, %v3719_v52  ;;  %v2586_v36 = vmax.f32 %v2152_v34, 0.0  ;;  %v3723_v3 = vpop.f32.mrb[68].mxu1 }
 0x16a   :  { %v1639_v2 = vpop.f32.mrb[69].mxu0  ;;  %v1648_v13 = vadd.f32 %v3591_v58, %v4429_v50  ;;  %v2870_v48 = vadd.f32 %v2869_v20, %v2585_v0  ;;  %v2167_v52 = vpop.f32.mrb[69].mxu1 }
 0x16b   :  { %v2716_v37 = vrot.slane %v2715_v55, 2  ;;  %v2721_v6 = vadd.f32 %v2720_v60, %v2456_v49  ;;  %v1640_v7 = vadd.f32 %v4429_v50, %v1639_v2  ;;  %v3592_v9 = vpop.f32.mrb[70].mxu0  ;;  %v2155_v49 = vadd.f32 %v4699_v21, %v2154_v24 }
 0x16c   :  { %v1642_v18 = vpop.f32.mrb[71].mxu0  ;;  %v1651_v31 = vadd.f32 %v4699_v21, %v3592_v9  ;;  %v2460_v58 = vmax.f32 %v1648_v13, 0.0  ;;  %v2871_v11 = vadd.f32 %v2870_v48, %v2586_v36 }
 0x16d   :  { %v2717_v26 = vadd.f32 %v2716_v37, %v2715_v55  ;;  %v2458_v39 = vmax.f32 %v1640_v7, 0.0  ;;  %v2722_v10 = vadd.f32 %v2721_v6, %v2457_v62  ;;  %v1643_v27 = vadd.f32 %v4699_v21, %v1642_v18 }
 0x16e   :  { %v2163_v55 = vadd.f32 %v4699_v21, %v3720_v16  ;;  %v2588_v6 = vmax.f32 %v2160_v35, 0.0  ;;  %v2587_v7 = vmax.f32 %v2155_v49, 0.0  ;;  %v2461_v34 = vmax.f32 %v1651_v31, 0.0  ;;  %v3724_v16 = vpop.f32.mrb[70].mxu1 }
 0x16f   :  { %v2718_v50 = vrot.slane %v2717_v26, 1  ;;  %v2723_v41 = vadd.f32 %v2722_v10, %v2458_v39  ;;  %v2459_v46 = vmax.f32 %v1643_v27, 0.0  ;;  %v2170_v10 = vpop.f32.mrb[71].mxu1 }
 0x170   :  { %v2872_v39 = vadd.f32 %v2871_v11, %v2587_v7 }
 0x171   :  { %v2719_v60 = vadd.f32 %v2718_v50, %v2717_v26  ;;  %v2724_v62 = vadd.f32 %v2723_v41, %v2459_v46  ;;  %v3595_v2 = vpop.f32.mrb[72].mxu0  ;;  %v2589_v26 = vmax.f32 %v2163_v55, 0.0  ;;  %v2989_v50 = vunpack.c.l.b16 %v2950_v63 }
 0x172   :  { %v1655_v37 = vpop.f32.mrb[73].mxu0  ;;  %v1664_v24 = vadd.f32 %v4699_v21, %v3595_v2  ;;  %v2873_v41 = vadd.f32 %v2872_v39, %v2588_v6  ;;  %v2176_v46 = vadd.f32 %v4699_v21, %v3723_v3  ;;  %v2179_v55 = vadd.f32 %v4699_v21, %v3724_v16  ;;  %v3727_v6 = vpop.f32.mrb[72].mxu1  ;;  %v3943_v3 = vld [vmem:[%s4923_s3 + $0x28] sm:$0xff]  }
 0x173   :  { %v2943_v9 = vmul.f32 0.00390625, %v2719_v60  ;;  %v2725_v18 = vadd.f32 %v2724_v62, %v2460_v58  ;;  %v1656_v0 = vadd.f32 %v4699_v21, %v1655_v37  ;;  %v3596_v20 = vpop.f32.mrb[74].mxu0  ;;  %v2168_v58 = vadd.f32 %v4699_v21, %v2167_v52  ;;  %3788 = vmatpush3.bf16.msra.mxu1 %v3943_v3 }
 0x174   :  { %v1658_v13 = vpop.f32.mrb[75].mxu0  ;;  %v1667_v31 = vadd.f32 %v4699_v21, %v3596_v20  ;;  %v2874_v62 = vadd.f32 %v2873_v41, %v2589_v26  ;;  %v2171_v2 = vadd.f32 %v4699_v21, %v2170_v10  ;;  %v2464_v37 = vmax.f32 %v1664_v24, 0.0  ;;  %3789 = vmatprep.subr.bf16.mxu1 %v3948_v40 }
 0x175   :  { %v2951_v27 = vpack.c.bf16 %v2943_v9, %v2943_v9  ;;  %v2462_v29 = vmax.f32 %v1656_v0, 0.0  ;;  %v2726_v36 = vadd.f32 %v2725_v18, %v2461_v34  ;;  %v1659_v35 = vadd.f32 %v4699_v21, %v1658_v13  ;;  %v2183_v0 = vpop.f32.mrb[73].mxu1 }
 0x176   :  { %v2590_v9 = vmax.f32 %v2168_v58, 0.0  ;;  %v2465_v34 = vmax.f32 %v1667_v31, 0.0  ;;  %v2591_v52 = vmax.f32 %v2171_v2, 0.0  ;;  %v2592_v26 = vmax.f32 %v2176_v46, 0.0  ;;  %v3728_v10 = vpop.f32.mrb[74].mxu1 }
 0x177   :  { %v2990_v48 = vunpack.c.l.b16 %v2951_v27  ;;  %v2727_v49 = vadd.f32 %v2726_v36, %v2462_v29  ;;  %v2463_v60 = vmax.f32 %v1659_v35, 0.0  ;;  %v2593_v29 = vmax.f32 %v2179_v55, 0.0  ;;  %v2186_v35 = vpop.f32.mrb[75].mxu1 }
 0x178   :  { %v2875_v39 = vadd.f32 %v2874_v62, %v2590_v9  ;;  %v2184_v36 = vadd.f32 %v4699_v21, %v2183_v0  ;;  %v2192_v46 = vadd.f32 %v4699_v21, %v3727_v6  ;;  %v2187_v55 = vadd.f32 %v4699_v21, %v2186_v35 }
 0x179   :  { %v4715_v11 = vsel %vm2997_vm2, %v2990_v48, %v2989_v50  ;;  %v2728_v63 = vadd.f32 %v2727_v49, %v2463_v60  ;;  %v3599_v7 = vpop.f32.mrb[76].mxu0 }
 0x17a   :  { %v1671_v18 = vpop.f32.mrb[77].mxu0  ;;  %v1680_v24 = vadd.f32 %v4699_v21, %v3599_v7  ;;  %v2876_v48 = vadd.f32 %v2875_v39, %v2591_v52  ;;  %v2594_v60 = vmax.f32 %v2184_v36, 0.0 }
 0x17b   :  { %v2729_v20 = vadd.f32 %v2728_v63, %v2464_v37  ;;  %v1672_v16 = vadd.f32 %v4699_v21, %v1671_v18  ;;  %v3600_v13 = vpop.f32.mrb[78].mxu0  ;;  %v2195_v37 = vadd.f32 %v4699_v21, %v3728_v10  ;;  %v3731_v18 = vpop.f32.mrb[76].mxu1 }
 0x17c   :  { %v1674_v27 = vpop.f32.mrb[79].mxu0  ;;  %v1683_v49 = vadd.f32 %v4699_v21, %v3600_v13  ;;  %v2877_v2 = vadd.f32 %v2876_v48, %v2592_v26  ;;  %v2468_v63 = vmax.f32 %v1680_v24, 0.0 }
 0x17d   :  { %v2466_v50 = vmax.f32 %v1672_v16, 0.0  ;;  %v2730_v31 = vadd.f32 %v2729_v20, %v2465_v34  ;;  %v1675_v41 = vadd.f32 %v4699_v21, %v1674_v27  ;;  %v2595_v34 = vmax.f32 %v2187_v55, 0.0  ;;  %v2199_v16 = vpop.f32.mrb[77].mxu1 }
 0x17e   :  { %v2878_v3 = vadd.f32 %v2877_v2, %v2593_v29  ;;  %v2469_v0 = vmax.f32 %v1683_v49, 0.0  ;;  %v2596_v20 = vmax.f32 %v2192_v46, 0.0  ;;  %v2200_v26 = vadd.f32 %v4699_v21, %v2199_v16  ;;  %v3732_v36 = vpop.f32.mrb[78].mxu1 }
 0x17f   :  { %v2731_v58 = vadd.f32 %v2730_v31, %v2466_v50  ;;  %v2467_v62 = vmax.f32 %v1675_v41, 0.0  ;;  %v2597_v35 = vmax.f32 %v2195_v37, 0.0  ;;  %v2202_v50 = vpop.f32.mrb[79].mxu1  ;;  %v2208_v46 = vadd.f32 %v4699_v21, %v3731_v18 }
 0x180   :  { %v2879_v27 = vadd.f32 %v2878_v3, %v2594_v60  ;;  %v2598_v55 = vmax.f32 %v2200_v26, 0.0 }
 0x181   :  { %v2732_v7 = vadd.f32 %v2731_v58, %v2467_v62  ;;  %v3603_v9 = vpop.f32.mrb[80].mxu0  ;;  %v2203_v58 = vadd.f32 %v4699_v21, %v2202_v50 }
 0x182   :  { %v1687_v52 = vpop.f32.mrb[81].mxu0  ;;  %v1696_v10 = vadd.f32 %v4699_v21, %v3603_v9  ;;  %v2880_v48 = vadd.f32 %v2879_v27, %v2595_v34 }
 0x183   :  { %v2733_v13 = vadd.f32 %v2732_v7, %v2468_v63  ;;  %v1688_v6 = vadd.f32 %v4699_v21, %v1687_v52  ;;  %v3604_v39 = vpop.f32.mrb[82].mxu0  ;;  %v2211_v63 = vadd.f32 %v4699_v21, %v3732_v36  ;;  %v3735_v52 = vpop.f32.mrb[80].mxu1 }
 0x184   :  { %v1690_v24 = vpop.f32.mrb[83].mxu0  ;;  %v1699_v49 = vadd.f32 %v4699_v21, %v3604_v39  ;;  %v2881_v2 = vadd.f32 %v2880_v48, %v2596_v20  ;;  %v2472_v7 = vmax.f32 %v1696_v10, 0.0 }
 0x185   :  { %v2470_v29 = vmax.f32 %v1688_v6, 0.0  ;;  %v2734_v31 = vadd.f32 %v2733_v13, %v2469_v0  ;;  %v1691_v41 = vadd.f32 %v4699_v21, %v1690_v24  ;;  %v2599_v0 = vmax.f32 %v2203_v58, 0.0  ;;  %v2215_v6 = vpop.f32.mrb[81].mxu1 }
 0x186   :  { %v2882_v3 = vadd.f32 %v2881_v2, %v2597_v35  ;;  %v2473_v16 = vmax.f32 %v1699_v49, 0.0  ;;  %v2600_v13 = vmax.f32 %v2208_v46, 0.0  ;;  %v2216_v20 = vadd.f32 %v4699_v21, %v2215_v6  ;;  %v3736_v26 = vpop.f32.mrb[82].mxu1 }
 0x187   :  { %v2735_v60 = vadd.f32 %v2734_v31, %v2470_v29  ;;  %v2471_v62 = vmax.f32 %v1691_v41, 0.0  ;;  %v2601_v50 = vmax.f32 %v2211_v63, 0.0  ;;  %v2218_v29 = vpop.f32.mrb[83].mxu1  ;;  %v2224_v46 = vadd.f32 %v4699_v21, %v3735_v52 }
 0x188   :  { %v2883_v24 = vadd.f32 %v2882_v3, %v2598_v55  ;;  %v2219_v58 = vadd.f32 %v4699_v21, %v2218_v29  ;;  %v2602_v55 = vmax.f32 %v2216_v20, 0.0 }
 0x189   :  { %v2736_v37 = vadd.f32 %v2735_v60, %v2471_v62  ;;  %v3607_v9 = vpop.f32.mrb[84].mxu0 }
 0x18a   :  { %v1703_v34 = vpop.f32.mrb[85].mxu0  ;;  %v1712_v36 = vadd.f32 %v4699_v21, %v3607_v9  ;;  %v2884_v48 = vadd.f32 %v2883_v24, %v2599_v0 }
 0x18b   :  { %v2737_v39 = vadd.f32 %v2736_v37, %v2472_v7  ;;  %v1704_v18 = vadd.f32 %v4699_v21, %v1703_v34  ;;  %v3608_v27 = vpop.f32.mrb[86].mxu0  ;;  %v2227_v7 = vadd.f32 %v4699_v21, %v3736_v26  ;;  %v3739_v34 = vpop.f32.mrb[84].mxu1  ;;  %v3944_v26 = vld [vmem:[%s4923_s3 + $0x30] sm:$0xff]  }
 0x18c   :  { %v1706_v10 = vpop.f32.mrb[87].mxu0  ;;  %v1715_v49 = vadd.f32 %v4699_v21, %v3608_v27  ;;  %v2885_v2 = vadd.f32 %v2884_v48, %v2600_v13  ;;  %v2476_v37 = vmax.f32 %v1712_v36, 0.0  ;;  %3790 = vmatpush3.bf16.msra.mxu1 %v3944_v26 }
 0x18d   :  { %v2474_v35 = vmax.f32 %v1704_v18, 0.0  ;;  %v2738_v31 = vadd.f32 %v2737_v39, %v2473_v16  ;;  %v1707_v41 = vadd.f32 %v4699_v21, %v1706_v10  ;;  %v2603_v16 = vmax.f32 %v2219_v58, 0.0  ;;  %v2231_v18 = vpop.f32.mrb[85].mxu1  ;;  %3791 = vmatprep.subr.bf16.mxu1 %v3948_v40 }
 0x18e   :  { %v2886_v3 = vadd.f32 %v2885_v2, %v2601_v50  ;;  %v2477_v6 = vmax.f32 %v1715_v49, 0.0  ;;  %v2604_v39 = vmax.f32 %v2224_v46, 0.0  ;;  %v2232_v13 = vadd.f32 %v4699_v21, %v2231_v18  ;;  %v3740_v20 = vpop.f32.mrb[86].mxu1  ;;  %v3945_v46 = vld [vmem:[%s4923_s3 + $0x38] sm:$0xff]  }
 0x18f   :  { %v2739_v60 = vadd.f32 %v2738_v31, %v2474_v35  ;;  %v2475_v62 = vmax.f32 %v1707_v41, 0.0  ;;  %v2605_v29 = vmax.f32 %v2227_v7, 0.0  ;;  %v2234_v35 = vpop.f32.mrb[87].mxu1 }
 0x190   :  { %v2887_v10 = vadd.f32 %v2886_v3, %v2602_v55  ;;  %v2235_v2 = vadd.f32 %v4699_v21, %v2234_v35  ;;  %3792 = vmatpush3.bf16.msra.mxu1 %v3945_v46 }
 0x191   :  { %v2740_v63 = vadd.f32 %v2739_v60, %v2475_v62  ;;  %v3611_v9 = vpop.f32.mrb[88].mxu0  ;;  %v2240_v60 = vadd.f32 %v4699_v21, %v3739_v34  ;;  %v2606_v62 = vmax.f32 %v2232_v13, 0.0  ;;  %v3743_v18 = vpop.f32.mrb[88].mxu1 }
 0x192   :  { %v1719_v0 = vpop.f32.mrb[89].mxu0  ;;  %v1728_v36 = vadd.f32 %v4699_v21, %v3611_v9  ;;  %v2888_v49 = vadd.f32 %v2887_v10, %v2603_v16 }
 0x193   :  { %v2741_v27 = vadd.f32 %v2740_v63, %v2476_v37  ;;  %v1720_v52 = vadd.f32 %v4699_v21, %v1719_v0  ;;  %v3612_v24 = vpop.f32.mrb[90].mxu0  ;;  %v2243_v63 = vadd.f32 %v4699_v21, %v3740_v20  ;;  %v2607_v0 = vmax.f32 %v2235_v2, 0.0 }
 0x194   :  { %v1722_v50 = vpop.f32.mrb[91].mxu0  ;;  %v1731_v58 = vadd.f32 %v4699_v21, %v3612_v24  ;;  %v2889_v37 = vadd.f32 %v2888_v49, %v2604_v39  ;;  %v2480_v9 = vmax.f32 %v1728_v36, 0.0  ;;  %v2247_v24 = vpop.f32.mrb[89].mxu1 }
 0x195   :  { %v2478_v31 = vmax.f32 %v1720_v52, 0.0  ;;  %v2742_v41 = vadd.f32 %v2741_v27, %v2477_v6  ;;  %v1723_v48 = vadd.f32 %v4699_v21, %v1722_v50  ;;  %v2608_v52 = vmax.f32 %v2240_v60, 0.0  ;;  %v3744_v50 = vpop.f32.mrb[90].mxu1 }
 0x196   :  { %v2890_v6 = vadd.f32 %v2889_v37, %v2605_v29  ;;  %v2481_v34 = vmax.f32 %v1731_v58, 0.0  ;;  %v2248_v20 = vadd.f32 %v4699_v21, %v2247_v24  ;;  %v2609_v35 = vmax.f32 %v2243_v63, 0.0  ;;  %v2250_v29 = vpop.f32.mrb[91].mxu1 }
 0x197   :  { %v2743_v55 = vadd.f32 %v2742_v41, %v2478_v31  ;;  %v2479_v7 = vmax.f32 %v1723_v48, 0.0  ;;  %v2256_v58 = vadd.f32 %v4699_v21, %v3743_v18  ;;  %v2251_v60 = vadd.f32 %v4699_v21, %v2250_v29 }
 0x198   :  { %v2891_v26 = vadd.f32 %v2890_v6, %v2606_v62  ;;  %v2259_v37 = vadd.f32 %v4699_v21, %v3744_v50 }
 0x199   :  { %v2744_v3 = vadd.f32 %v2743_v55, %v2479_v7  ;;  %v3615_v16 = vpop.f32.mrb[92].mxu0  ;;  %v2610_v7 = vmax.f32 %v2248_v20, 0.0  ;;  %v2611_v6 = vmax.f32 %v2251_v60, 0.0  ;;  %v2612_v24 = vmax.f32 %v2256_v58, 0.0 }
 0x19a   :  { %v1735_v27 = vpop.f32.mrb[93].mxu0  ;;  %v1744_v40 = vadd.f32 %v4699_v21, %v3615_v16  ;;  %v2892_v49 = vadd.f32 %v2891_v26, %v2607_v0  ;;  %v2613_v50 = vmax.f32 %v2259_v37, 0.0 }
 0x19b   :  { %v2745_v10 = vadd.f32 %v2744_v3, %v2480_v9  ;;  %v1736_v13 = vadd.f32 %v4699_v21, %v1735_v27  ;;  %v3616_v39 = vpop.f32.mrb[94].mxu0 }
 0x19c   :  { %v1738_v36 = vpop.f32.mrb[95].mxu0  ;;  %v1747_v46 = vadd.f32 %v4699_v21, %v3616_v39  ;;  %v2893_v55 = vadd.f32 %v2892_v49, %v2608_v52  ;;  %v2484_v9 = vmax.f32 %v1744_v40, 0.0 }
 0x19d   :  { %v2482_v31 = vmax.f32 %v1736_v13, 0.0  ;;  %v2746_v41 = vadd.f32 %v2745_v10, %v2481_v34  ;;  %v1739_v48 = vadd.f32 %v4699_v21, %v1738_v36  ;;  %v3747_v34 = vpop.f32.mrb[92].mxu1 }
 0x19e   :  { %v2894_v16 = vadd.f32 %v2893_v55, %v2609_v35  ;;  %v2485_v27 = vmax.f32 %v1747_v46, 0.0  ;;  %v2263_v10 = vpop.f32.mrb[93].mxu1  ;;  %v2272_v40 = vadd.f32 %v4699_v21, %v3747_v34 }
 0x19f   :  { %v2747_v62 = vadd.f32 %v2746_v41, %v2482_v31  ;;  %v2483_v2 = vmax.f32 %v1739_v48, 0.0  ;;  %v2264_v52 = vadd.f32 %v4699_v21, %v2263_v10  ;;  %v3748_v20 = vpop.f32.mrb[94].mxu1 }
 0x1a0   :  { %v2895_v26 = vadd.f32 %v2894_v16, %v2610_v7  ;;  %v2266_v29 = vpop.f32.mrb[95].mxu1  ;;  %v2275_v58 = vadd.f32 %v4699_v21, %v3748_v20  ;;  %v2616_v37 = vmax.f32 %v2272_v40, 0.0 }
 0x1a1   :  { %v2748_v63 = vadd.f32 %v2747_v62, %v2483_v2  ;;  %v3619_v3 = vpop.f32.mrb[96].mxu0  ;;  %v2614_v46 = vmax.f32 %v2264_v52, 0.0  ;;  %v2267_v60 = vadd.f32 %v4699_v21, %v2266_v29 }
 0x1a2   :  { %v1751_v0 = vpop.f32.mrb[97].mxu0  ;;  %v1760_v31 = vadd.f32 %v4699_v21, %v3619_v3  ;;  %v2896_v48 = vadd.f32 %v2895_v26, %v2611_v6  ;;  %v3751_v6 = vpop.f32.mrb[96].mxu1  ;;  %v2617_v10 = vmax.f32 %v2275_v58, 0.0 }
 0x1a3   :  { %v2749_v13 = vadd.f32 %v2748_v63, %v2484_v9  ;;  %v1752_v18 = vadd.f32 %v4699_v21, %v1751_v0  ;;  %v3620_v39 = vpop.f32.mrb[98].mxu0  ;;  %v2615_v9 = vmax.f32 %v2267_v60, 0.0 }
 0x1a4   :  { %v1754_v36 = vpop.f32.mrb[99].mxu0  ;;  %v1763_v49 = vadd.f32 %v4699_v21, %v3620_v39  ;;  %v2897_v7 = vadd.f32 %v2896_v48, %v2612_v24  ;;  %v2488_v16 = vmax.f32 %v1760_v31, 0.0  ;;  %v2279_v39 = vpop.f32.mrb[97].mxu1 }
 0x1a5   :  { %v2750_v35 = vadd.f32 %v2749_v13, %v2485_v27  ;;  %v1755_v41 = vadd.f32 %v4699_v21, %v1754_v36  ;;  %v2486_v2 = vmax.f32 %v1752_v18, 0.0  ;;  %v2905_v13 = vadd.f32 %v2615_v9, %v2614_v46  ;;  %v3752_v24 = vpop.f32.mrb[98].mxu1 }
 0x1a6   :  { %v4777_v27 = vadd.f32 %v2897_v7, %v2613_v50  ;;  %v2489_v52 = vmax.f32 %v1763_v49, 0.0  ;;  %v2282_v31 = vpop.f32.mrb[99].mxu1  ;;  %v2288_v46 = vadd.f32 %v4699_v21, %v3751_v6  ;;  %v2280_v58 = vadd.f32 %v4699_v21, %v2279_v39 }
 0x1a7   :  { %v2751_v62 = vrot.slane %v2750_v35, 4  ;;  %v2487_v55 = vmax.f32 %v1755_v41, 0.0 }
 0x1a8   :  { %v2618_v9 = vmax.f32 %v2280_v58, 0.0  ;;  %v2620_v6 = vmax.f32 %v2288_v46, 0.0 }
 0x1a9   :  { %v2752_v63 = vadd.f32 %v2751_v62, %v2750_v35  ;;  %v2757_v34 = vadd.f32 %v2487_v55, %v2486_v2  ;;  %v3623_v3 = vpop.f32.mrb[100].mxu0  ;;  %v2906_v35 = vadd.f32 %v2905_v13, %v2616_v37  ;;  %v2283_v37 = vadd.f32 %v4699_v21, %v2282_v31  ;;  %v3755_v13 = vpop.f32.mrb[100].mxu1 }
 0x1aa   :  { %v1767_v0 = vpop.f32.mrb[101].mxu0  ;;  %v1776_v40 = vadd.f32 %v4699_v21, %v3623_v3 }
 0x1ab   :  { %v2753_v26 = vrot.slane %v2752_v63, 2  ;;  %v2758_v20 = vadd.f32 %v2757_v34, %v2488_v16  ;;  %v1768_v18 = vadd.f32 %v4699_v21, %v1767_v0  ;;  %v3624_v36 = vpop.f32.mrb[102].mxu0  ;;  %v2907_v49 = vadd.f32 %v2906_v35, %v2617_v10  ;;  %v2295_v10 = vpop.f32.mrb[101].mxu1 }
 0x1ac   :  { %v1770_v29 = vpop.f32.mrb[103].mxu0  ;;  %v1779_v55 = vadd.f32 %v4699_v21, %v3624_v36  ;;  %v2291_v16 = vadd.f32 %v4699_v21, %v3752_v24  ;;  %v2492_v34 = vmax.f32 %v1776_v40, 0.0  ;;  %v2619_v39 = vmax.f32 %v2283_v37, 0.0 }
 0x1ad   :  { %v2754_v41 = vadd.f32 %v2753_v26, %v2752_v63  ;;  %v2490_v50 = vmax.f32 %v1768_v18, 0.0  ;;  %v2759_v48 = vadd.f32 %v2758_v20, %v2489_v52  ;;  %v1771_v60 = vadd.f32 %v4699_v21, %v1770_v29 }
 0x1ae   :  { %v2908_v52 = vadd.f32 %v2907_v49, %v2618_v9  ;;  %v2493_v18 = vmax.f32 %v1779_v55, 0.0  ;;  %v2304_v55 = vadd.f32 %v4699_v21, %v3755_v13 }
 0x1af   :  { %v2755_v62 = vrot.slane %v2754_v41, 1  ;;  %v2760_v2 = vadd.f32 %v2759_v48, %v2490_v50  ;;  %v2491_v7 = vmax.f32 %v1771_v60, 0.0  ;;  %v3756_v50 = vpop.f32.mrb[102].mxu1 }
 0x1b0   :  { %v2909_v40 = vadd.f32 %v2908_v52, %v2619_v39  ;;  %v2298_v48 = vpop.f32.mrb[103].mxu1 }
 0x1b1   :  { %v2756_v63 = vadd.f32 %v2755_v62, %v2754_v41  ;;  %v2761_v3 = vadd.f32 %v2760_v2, %v2491_v7  ;;  %v3627_v0 = vpop.f32.mrb[104].mxu0  ;;  %v2621_v41 = vmax.f32 %v2291_v16, 0.0  ;;  %v2307_v16 = vadd.f32 %v4699_v21, %v3756_v50 }
 0x1b2   :  { %v1783_v26 = vpop.f32.mrb[105].mxu0  ;;  %v1792_v24 = vadd.f32 %v4699_v21, %v3627_v0  ;;  %v2910_v2 = vadd.f32 %v2909_v40, %v2620_v6  ;;  %v3759_v6 = vpop.f32.mrb[104].mxu1 }
 0x1b3   :  { %v2944_v20 = vmul.f32 0.00390625, %v2756_v63  ;;  %v2762_v29 = vadd.f32 %v2761_v3, %v2492_v34  ;;  %v1784_v36 = vadd.f32 %v4699_v21, %v1783_v26  ;;  %v3628_v35 = vpop.f32.mrb[106].mxu0  ;;  %v2296_v63 = vadd.f32 %v4699_v21, %v2295_v10 }
 0x1b4   :  { %v1786_v31 = vpop.f32.mrb[107].mxu0  ;;  %v1795_v49 = vadd.f32 %v4699_v21, %v3628_v35  ;;  %v2911_v34 = vadd.f32 %v2910_v2, %v2621_v41  ;;  %v2299_v3 = vadd.f32 %v4699_v21, %v2298_v48  ;;  %v2496_v26 = vmax.f32 %v1792_v24, 0.0 }
 0x1b5   :  { %v2952_v60 = vpack.c.bf16 %v2944_v20, %v2944_v20  ;;  %v2494_v58 = vmax.f32 %v1784_v36, 0.0  ;;  %v2763_v62 = vadd.f32 %v2762_v29, %v2493_v18  ;;  %v1787_v46 = vadd.f32 %v4699_v21, %v1786_v31  ;;  %v2311_v36 = vpop.f32.mrb[105].mxu1 }
 0x1b6   :  { %v2622_v20 = vmax.f32 %v2296_v63, 0.0  ;;  %v2497_v18 = vmax.f32 %v1795_v49, 0.0  ;;  %v2623_v29 = vmax.f32 %v2299_v3, 0.0  ;;  %v2624_v41 = vmax.f32 %v2304_v55, 0.0  ;;  %v3760_v40 = vpop.f32.mrb[106].mxu1 }
 0x1b7   :  { %v2991_v7 = vunpack.c.l.b16 %v2952_v60  ;;  %v2764_v9 = vadd.f32 %v2763_v62, %v2494_v58  ;;  %v2495_v37 = vmax.f32 %v1787_v46, 0.0  ;;  %v2625_v60 = vmax.f32 %v2307_v16, 0.0  ;;  %v2314_v58 = vpop.f32.mrb[107].mxu1 }
 0x1b8   :  { %v2912_v50 = vadd.f32 %v2911_v34, %v2622_v20  ;;  %v2312_v24 = vadd.f32 %v4699_v21, %v2311_v36  ;;  %v2315_v3 = vadd.f32 %v4699_v21, %v2314_v58  ;;  %v2323_v16 = vadd.f32 %v4699_v21, %v3760_v40 }
 0x1b9   :  { %v4796_v0 = vsel %vm2999_vm4, %v2991_v7, %v4715_v11  ;;  %v2765_v52 = vadd.f32 %v2764_v9, %v2495_v37  ;;  %v3631_v39 = vpop.f32.mrb[108].mxu0  ;;  %v2320_v9 = vadd.f32 %v4699_v21, %v3759_v6 }
 0x1ba   :  { %v1799_v13 = vpop.f32.mrb[109].mxu0  ;;  %v1808_v48 = vadd.f32 %v4699_v21, %v3631_v39  ;;  %v2913_v2 = vadd.f32 %v2912_v50, %v2623_v29  ;;  %v2626_v37 = vmax.f32 %v2312_v24, 0.0  ;;  %v2629_v58 = vmax.f32 %v2323_v16, 0.0 }
 0x1bb   :  { %v2766_v35 = vadd.f32 %v2765_v52, %v2496_v26  ;;  %v1800_v10 = vadd.f32 %v4699_v21, %v1799_v13  ;;  %v3632_v31 = vpop.f32.mrb[110].mxu0  ;;  %v3763_v13 = vpop.f32.mrb[108].mxu1 }
 0x1bc   :  { %v1802_v11 = vpop.f32.mrb[111].mxu0  ;;  %v1811_v7 = vadd.f32 %v4699_v21, %v3632_v31  ;;  %v2914_v34 = vadd.f32 %v2913_v2, %v2624_v41  ;;  %v2500_v26 = vmax.f32 %v1808_v48, 0.0 }
 0x1bd   :  { %v2498_v62 = vmax.f32 %v1800_v10, 0.0  ;;  %v2767_v46 = vadd.f32 %v2766_v35, %v2497_v18  ;;  %v1803_v49 = vadd.f32 %v4699_v21, %v1802_v11  ;;  %v2627_v18 = vmax.f32 %v2315_v3, 0.0  ;;  %v2327_v10 = vpop.f32.mrb[109].mxu1 }
 0x1be   :  { %v2915_v20 = vadd.f32 %v2914_v34, %v2625_v60  ;;  %v2501_v36 = vmax.f32 %v1811_v7, 0.0  ;;  %v2628_v35 = vmax.f32 %v2320_v9, 0.0  ;;  %v2328_v41 = vadd.f32 %v4699_v21, %v2327_v10  ;;  %v3764_v24 = vpop.f32.mrb[110].mxu1 }
 0x1bf   :  { %v2768_v55 = vadd.f32 %v2767_v46, %v2498_v62  ;;  %v2499_v63 = vmax.f32 %v1803_v49, 0.0  ;;  %v2330_v62 = vpop.f32.mrb[111].mxu1  ;;  %v2336_v9 = vadd.f32 %v4699_v21, %v3763_v13 }
 0x1c0   :  { %v2916_v11 = vadd.f32 %v2915_v20, %v2626_v37  ;;  %v2630_v3 = vmax.f32 %v2328_v41, 0.0 }
 0x1c1   :  { %v2769_v52 = vadd.f32 %v2768_v55, %v2499_v63  ;;  %v3635_v39 = vpop.f32.mrb[112].mxu0  ;;  %v2331_v55 = vadd.f32 %v4699_v21, %v2330_v62 }
 0x1c2   :  { %v1815_v29 = vpop.f32.mrb[113].mxu0  ;;  %v1824_v40 = vadd.f32 %v4699_v21, %v3635_v39  ;;  %v2917_v2 = vadd.f32 %v2916_v11, %v2627_v18 }
 0x1c3   :  { %v2770_v31 = vadd.f32 %v2769_v52, %v2500_v26  ;;  %v1816_v6 = vadd.f32 %v4699_v21, %v1815_v29  ;;  %v3636_v50 = vpop.f32.mrb[114].mxu0  ;;  %v2339_v26 = vadd.f32 %v4699_v21, %v3764_v24  ;;  %v3767_v29 = vpop.f32.mrb[112].mxu1 }
 0x1c4   :  { %v1818_v48 = vpop.f32.mrb[115].mxu0  ;;  %v1827_v7 = vadd.f32 %v4699_v21, %v3636_v50  ;;  %v2918_v34 = vadd.f32 %v2917_v2, %v2628_v35  ;;  %v2504_v52 = vmax.f32 %v1824_v40, 0.0 }
 0x1c5   :  { %v2502_v60 = vmax.f32 %v1816_v6, 0.0  ;;  %v2771_v46 = vadd.f32 %v2770_v31, %v2501_v36  ;;  %v1819_v49 = vadd.f32 %v4699_v21, %v1818_v48  ;;  %v2631_v36 = vmax.f32 %v2331_v55, 0.0  ;;  %v2343_v6 = vpop.f32.mrb[113].mxu1 }
 0x1c6   :  { %v2919_v20 = vadd.f32 %v2918_v34, %v2629_v58  ;;  %v2505_v10 = vmax.f32 %v1827_v7, 0.0  ;;  %v2632_v31 = vmax.f32 %v2336_v9, 0.0  ;;  %v2344_v35 = vadd.f32 %v4699_v21, %v2343_v6  ;;  %v3768_v41 = vpop.f32.mrb[114].mxu1 }
 0x1c7   :  { %v2772_v37 = vadd.f32 %v2771_v46, %v2502_v60  ;;  %v2503_v63 = vmax.f32 %v1819_v49, 0.0  ;;  %v2633_v62 = vmax.f32 %v2339_v26, 0.0  ;;  %v2346_v60 = vpop.f32.mrb[115].mxu1  ;;  %v2352_v9 = vadd.f32 %v4699_v21, %v3767_v29 }
 0x1c8   :  { %v2920_v48 = vadd.f32 %v2919_v20, %v2630_v3  ;;  %v2347_v55 = vadd.f32 %v4699_v21, %v2346_v60  ;;  %v2634_v3 = vmax.f32 %v2344_v35, 0.0 }
 0x1c9   :  { %v2773_v16 = vadd.f32 %v2772_v37, %v2503_v63  ;;  %v3639_v39 = vpop.f32.mrb[116].mxu0 }
 0x1ca   :  { %v1831_v18 = vpop.f32.mrb[117].mxu0  ;;  %v1840_v24 = vadd.f32 %v4699_v21, %v3639_v39  ;;  %v2921_v2 = vadd.f32 %v2920_v48, %v2631_v36 }
 0x1cb   :  { %v2774_v50 = vadd.f32 %v2773_v16, %v2504_v52  ;;  %v1832_v13 = vadd.f32 %v4699_v21, %v1831_v18  ;;  %v3640_v11 = vpop.f32.mrb[118].mxu0  ;;  %v2355_v52 = vadd.f32 %v4699_v21, %v3768_v41  ;;  %v3771_v18 = vpop.f32.mrb[116].mxu1 }
 0x1cc   :  { %v1834_v40 = vpop.f32.mrb[119].mxu0  ;;  %v1843_v7 = vadd.f32 %v4699_v21, %v3640_v11  ;;  %v2922_v34 = vadd.f32 %v2921_v2, %v2632_v31  ;;  %v2508_v16 = vmax.f32 %v1840_v24, 0.0 }
 0x1cd   :  { %v2506_v58 = vmax.f32 %v1832_v13, 0.0  ;;  %v2775_v46 = vadd.f32 %v2774_v50, %v2505_v10  ;;  %v1835_v49 = vadd.f32 %v4699_v21, %v1834_v40  ;;  %v2635_v10 = vmax.f32 %v2347_v55, 0.0  ;;  %v2359_v13 = vpop.f32.mrb[117].mxu1 }
 0x1ce   :  { %v2923_v20 = vadd.f32 %v2922_v34, %v2633_v62  ;;  %v2509_v6 = vmax.f32 %v1843_v7, 0.0  ;;  %v2636_v50 = vmax.f32 %v2352_v9, 0.0  ;;  %v2360_v31 = vadd.f32 %v4699_v21, %v2359_v13  ;;  %v3772_v35 = vpop.f32.mrb[118].mxu1 }
 0x1cf   :  { %v2776_v37 = vadd.f32 %v2775_v46, %v2506_v58  ;;  %v2507_v63 = vmax.f32 %v1835_v49, 0.0  ;;  %v2637_v60 = vmax.f32 %v2355_v52, 0.0  ;;  %v2362_v58 = vpop.f32.mrb[119].mxu1  ;;  %v2368_v9 = vadd.f32 %v4699_v21, %v3771_v18 }
 0x1d0   :  { %v2924_v40 = vadd.f32 %v2923_v20, %v2634_v3  ;;  %v2363_v55 = vadd.f32 %v4699_v21, %v2362_v58  ;;  %v2638_v3 = vmax.f32 %v2360_v31, 0.0 }
 0x1d1   :  { %v2777_v26 = vadd.f32 %v2776_v37, %v2507_v63  ;;  %v3643_v39 = vpop.f32.mrb[120].mxu0 }
 0x1d2   :  { %v1847_v36 = vpop.f32.mrb[121].mxu0  ;;  %v1856_v41 = vadd.f32 %v4699_v21, %v3643_v39  ;;  %v2925_v2 = vadd.f32 %v2924_v40, %v2635_v10 }
 0x1d3   :  { %v2778_v11 = vadd.f32 %v2777_v26, %v2508_v16  ;;  %v1848_v29 = vadd.f32 %v4699_v21, %v1847_v36  ;;  %v3644_v48 = vpop.f32.mrb[122].mxu0  ;;  %v2371_v16 = vadd.f32 %v4699_v21, %v3772_v35  ;;  %v3775_v36 = vpop.f32.mrb[120].mxu1 }
 0x1d4   :  { %v1850_v24 = vpop.f32.mrb[123].mxu0  ;;  %v1859_v7 = vadd.f32 %v4699_v21, %v3644_v48  ;;  %v2926_v34 = vadd.f32 %v2925_v2, %v2636_v50  ;;  %v2512_v26 = vmax.f32 %v1856_v41, 0.0 }
 0x1d5   :  { %v2510_v62 = vmax.f32 %v1848_v29, 0.0  ;;  %v2779_v46 = vadd.f32 %v2778_v11, %v2509_v6  ;;  %v1851_v49 = vadd.f32 %v4699_v21, %v1850_v24  ;;  %v2639_v6 = vmax.f32 %v2363_v55, 0.0  ;;  %v2375_v29 = vpop.f32.mrb[121].mxu1 }
 0x1d6   :  { %v2927_v20 = vadd.f32 %v2926_v34, %v2637_v60  ;;  %v2513_v13 = vmax.f32 %v1859_v7, 0.0  ;;  %v2640_v11 = vmax.f32 %v2368_v9, 0.0  ;;  %v2376_v50 = vadd.f32 %v4699_v21, %v2375_v29  ;;  %v3776_v31 = vpop.f32.mrb[122].mxu1 }
 0x1d7   :  { %v2780_v37 = vadd.f32 %v2779_v46, %v2510_v62  ;;  %v2511_v63 = vmax.f32 %v1851_v49, 0.0  ;;  %v2641_v58 = vmax.f32 %v2371_v16, 0.0  ;;  %v2378_v62 = vpop.f32.mrb[123].mxu1  ;;  %v2384_v9 = vadd.f32 %v4699_v21, %v3775_v36 }
 0x1d8   :  { %v2928_v24 = vadd.f32 %v2927_v20, %v2638_v3  ;;  %v2379_v55 = vadd.f32 %v4699_v21, %v2378_v62  ;;  %v2642_v3 = vmax.f32 %v2376_v50, 0.0 }
 0x1d9   :  { %v2781_v52 = vadd.f32 %v2780_v37, %v2511_v63  ;;  %v3647_v39 = vpop.f32.mrb[124].mxu0  ;;  %v2644_v29 = vmax.f32 %v2384_v9, 0.0 }
 0x1da   :  { %v1863_v10 = vpop.f32.mrb[125].mxu0  ;;  %v1872_v35 = vadd.f32 %v4699_v21, %v3647_v39  ;;  %v2929_v2 = vadd.f32 %v2928_v24, %v2639_v6 }
 0x1db   :  { %v2782_v48 = vadd.f32 %v2781_v52, %v2512_v26  ;;  %v1864_v18 = vadd.f32 %v4699_v21, %v1863_v10  ;;  %v3648_v40 = vpop.f32.mrb[126].mxu0  ;;  %v2387_v26 = vadd.f32 %v4699_v21, %v3776_v31 }
 0x1dc   :  { %v1866_v41 = vpop.f32.mrb[127].mxu0  ;;  %v1875_v7 = vadd.f32 %v4699_v21, %v3648_v40  ;;  %v2930_v34 = vadd.f32 %v2929_v2, %v2640_v11  ;;  %v2516_v52 = vmax.f32 %v1872_v35, 0.0  ;;  %v1896_v2 = vadd.f32 %v4699_v21, %v4459_v8 }
 0x1dd   :  { %v2514_v60 = vmax.f32 %v1864_v18, 0.0  ;;  %v2783_v46 = vadd.f32 %v2782_v48, %v2513_v13  ;;  %v1867_v49 = vadd.f32 %v4699_v21, %v1866_v41  ;;  %v2643_v13 = vmax.f32 %v2379_v55, 0.0 }
 0x1de   :  { %v2931_v20 = vadd.f32 %v2930_v34, %v2641_v58  ;;  %v2517_v6 = vmax.f32 %v1875_v7, 0.0  ;;  %v2645_v41 = vmax.f32 %v2387_v26, 0.0  ;;  %v2522_v8 = vmax.f32 %v1896_v2, 0.0 }
 0x1df   :  { %v2784_v37 = vadd.f32 %v2783_v46, %v2514_v60  ;;  %v2515_v63 = vmax.f32 %v1867_v49, 0.0 }
 0x1e0   :  { %v2932_v40 = vadd.f32 %v2931_v20, %v2642_v3 }
 0x1e1   :  { %v2785_v16 = vadd.f32 %v2784_v37, %v2515_v63  ;;  %v3651_v39 = vpop.f32.mrb[128].mxu0  ;;  %v4849_v63 = vld [vmem:[%s4924_s2] ss:$0 sm:$0xff] }
 0x1e2   :  { %v1879_v10 = vpop.f32.mrb[129].mxu0  ;;  %v1888_v11 = vadd.f32 %v4699_v21, %v3651_v39  ;;  %v2933_v31 = vadd.f32 %v2932_v40, %v2643_v13  ;;  %v1899_v34 = vadd.f32 %v4849_v63, %v4470_v17  ;;  %v1907_v20 = vadd.f32 %v4849_v63, %v4465_v14 }
 0x1e3   :  { %v2786_v48 = vadd.f32 %v2785_v16, %v2516_v52  ;;  %v1880_v18 = vadd.f32 %v4699_v21, %v1879_v10  ;;  %v3652_v36 = vpop.f32.mrb[130].mxu0  ;;  %v1904_v16 = vadd.f32 %v4849_v63, %v4451_v4  ;;  %v1915_v40 = vadd.f32 %v4849_v63, %v4498_v42 }
 0x1e4   :  { %v1882_v24 = vpop.f32.mrb[131].mxu0  ;;  %v1891_v35 = vadd.f32 %v4699_v21, %v3652_v36  ;;  %v2934_v49 = vadd.f32 %v2933_v31, %v2644_v29  ;;  %v2520_v9 = vmax.f32 %v1888_v11, 0.0  ;;  %v2523_v13 = vmax.f32 %v1899_v34, 0.0 }
 0x1e5   :  { %v2787_v62 = vadd.f32 %v2786_v48, %v2517_v6  ;;  %v1883_v50 = vadd.f32 %v4699_v21, %v1882_v24  ;;  %v2518_v60 = vmax.f32 %v1880_v18, 0.0  ;;  %v2524_v6 = vmax.f32 %v1904_v16, 0.0 }
 0x1e6   :  { %v4844_v37 = vadd.f32 %v2934_v49, %v2645_v41  ;;  %v2521_v26 = vmax.f32 %v1891_v35, 0.0  ;;  %v1912_v48 = vadd.f32 %v4849_v63, %v4487_v32  ;;  %v2525_v36 = vmax.f32 %v1907_v20, 0.0 }
 0x1e7   :  { %v2788_v58 = vrot.slane %v2787_v62, 4  ;;  %v2519_v46 = vmax.f32 %v1883_v50, 0.0  ;;  %v1920_v41 = vadd.f32 %v4849_v63, %v4479_v28  ;;  %v1923_v50 = vadd.f32 %v4849_v63, %v4493_v38 }
 0x1e8   :  { %v2527_v31 = vmax.f32 %v1915_v40, 0.0  ;;  %v1931_v28 = vadd.f32 %v4849_v63, %v4529_v5  ;;  %v1947_v5 = vadd.f32 %v4849_v63, %v4555_v33  ;;  %v1963_v33 = vadd.f32 %v4849_v63, %v4576_v61 }
 0x1e9   :  { %v2789_v7 = vadd.f32 %v2788_v58, %v2787_v62  ;;  %v2794_v55 = vadd.f32 %v2519_v46, %v2518_v60  ;;  %v2526_v62 = vmax.f32 %v1912_v48, 0.0  ;;  %v2528_v58 = vmax.f32 %v1920_v41, 0.0 }
 0x1ea   :  { %v1928_v60 = vadd.f32 %v4849_v63, %v4518_v59  ;;  %v2529_v49 = vmax.f32 %v1923_v50, 0.0  ;;  %v2531_v34 = vmax.f32 %v1931_v28, 0.0  ;;  %v1979_v61 = vadd.f32 %v4849_v63, %v4590_v25 }
 0x1eb   :  { %v2790_v3 = vrot.slane %v2789_v7, 2  ;;  %v2795_v52 = vadd.f32 %v2794_v55, %v2520_v9  ;;  %v1939_v55 = vadd.f32 %v4849_v63, %v4524_v1  ;;  %v1955_v1 = vadd.f32 %v4849_v63, %v4553_v30 }
 0x1ec   :  { %v2530_v38 = vmax.f32 %v1928_v60, 0.0  ;;  %v1971_v30 = vadd.f32 %v4849_v63, %v4571_v57  ;;  %v1987_v57 = vadd.f32 %v4849_v63, %v4588_v22 }
 0x1ed   :  { %v2791_v21 = vadd.f32 %v2790_v3, %v2789_v7  ;;  %v2796_v39 = vadd.f32 %v2795_v52, %v2521_v26  ;;  %v1936_v7 = vadd.f32 %v4849_v63, %v4507_v54  ;;  %v2533_v52 = vmax.f32 %v1939_v55, 0.0 }
 0x1ee   :  { %v1952_v54 = vadd.f32 %v4849_v63, %v4539_v19  ;;  %v1968_v19 = vadd.f32 %v4849_v63, %v4563_v47  ;;  %v1984_v47 = vadd.f32 %v4849_v63, %v4583_v12  ;;  %v2545_v60 = vmax.f32 %v1987_v57, 0.0 }
 0x1ef   :  { %v2792_v10 = vrot.slane %v2791_v21, 1  ;;  %v2797_v29 = vadd.f32 %v2796_v39, %v2522_v8  ;;  %v2532_v59 = vmax.f32 %v1936_v7, 0.0  ;;  %v2535_v39 = vmax.f32 %v1947_v5, 0.0 }
 0x1f0   :  { %v2540_v40 = vmax.f32 %v1968_v19, 0.0  ;;  %v1995_v12 = vadd.f32 %v4849_v63, %v4602_v56 }
 0x1f1   :  { %v2793_v17 = vadd.f32 %v2792_v10, %v2791_v21  ;;  %v2798_v18 = vadd.f32 %v2797_v29, %v2523_v13  ;;  %v2536_v13 = vmax.f32 %v1952_v54, 0.0  ;;  %v2537_v29 = vmax.f32 %v1955_v1, 0.0 }
 0x1f3   :  { %v2945_v4 = vmul.f32 0.00390625, %v2793_v17  ;;  %v2799_v24 = vadd.f32 %v2798_v18, %v2524_v6  ;;  %v2539_v18 = vmax.f32 %v1963_v33, 0.0 }
 0x1f5   :  { %v2953_v14 = vpack.c.bf16 %v2945_v4, %v2945_v4  ;;  %v2800_v11 = vadd.f32 %v2799_v24, %v2525_v36  ;;  %v2541_v24 = vmax.f32 %v1971_v30, 0.0 }
 0x1f7   :  { %v2992_v32 = vunpack.c.l.b16 %v2953_v14  ;;  %v2801_v35 = vadd.f32 %v2800_v11, %v2526_v62  ;;  %v2543_v11 = vmax.f32 %v1979_v61, 0.0 }
 0x1f9   :  { %v4868_v42 = vsel %vm3001_vm5, %v2992_v32, %v4796_v0  ;;  %v2802_v46 = vadd.f32 %v2801_v35, %v2527_v31  ;;  %v1944_v0 = vadd.f32 %v4849_v63, %v4547_v23  ;;  %v1960_v23 = vadd.f32 %v4849_v63, %v4568_v51 }
 0x1fa   :  { %v1976_v51 = vadd.f32 %v4849_v63, %v4585_v15  ;;  %v2862_v31 = vrot.slane %v4691_v44, 4  ;;  %v2544_v32 = vmax.f32 %v1984_v47, 0.0  ;;  %v1992_v15 = vadd.f32 %v4849_v63, %v4597_v45 }
 0x1fb   :  { %v2803_v2 = vadd.f32 %v2802_v46, %v2528_v58  ;;  %v2534_v8 = vmax.f32 %v1944_v0, 0.0  ;;  %v2538_v48 = vmax.f32 %v1960_v23, 0.0  ;;  %v2899_v35 = vrot.slane %v4777_v27, 4 }
 0x1fc   :  { %v2542_v62 = vmax.f32 %v1976_v51, 0.0  ;;  %v2936_v58 = vrot.slane %v4844_v37, 4  ;;  %v2863_v22 = vadd.f32 %v2862_v31, %v4691_v44  ;;  %v2546_v28 = vmax.f32 %v1992_v15, 0.0 }
 0x1fd   :  { %v2804_v9 = vadd.f32 %v2803_v2, %v2529_v49  ;;  %v2000_v49 = vadd.f32 %v4849_v63, %v4595_v43  ;;  %v2900_v2 = vadd.f32 %v2899_v35, %v4777_v27 }
 0x1fe   :  { %v2937_v45 = vadd.f32 %v2936_v58, %v4844_v37 }
 0x1ff   :  { %v2805_v3 = vadd.f32 %v2804_v9, %v2530_v38  ;;  %v2003_v38 = vadd.f32 %v4849_v63, %v4600_v53  ;;  %v2547_v9 = vmax.f32 %v1995_v12, 0.0  ;;  %v2901_v56 = vrot.slane %v2900_v2, 2 }
 0x200   :  { %v2938_v0 = vrot.slane %v2937_v45, 2 }
 0x201   :  { %v2806_v26 = vadd.f32 %v2805_v3, %v2531_v34  ;;  %v2864_v34 = vrot.slane %v2863_v22, 2  ;;  %v2548_v3 = vmax.f32 %v2000_v49, 0.0  ;;  %v2549_v44 = vmax.f32 %v2003_v38, 0.0 }
 0x202   :  { %v2902_v43 = vadd.f32 %v2901_v56, %v2900_v2 }
 0x203   :  { %v2807_v16 = vadd.f32 %v2806_v26, %v2532_v59 }
 0x205   :  { %v2808_v21 = vadd.f32 %v2807_v16, %v2533_v52  ;;  %v2865_v52 = vadd.f32 %v2864_v34, %v2863_v22  ;;  %v2939_v16 = vadd.f32 %v2938_v0, %v2937_v45 }
 0x207   :  { %v2809_v20 = vadd.f32 %v2808_v21, %v2534_v8  ;;  %v2866_v54 = vrot.slane %v2865_v52, 1  ;;  %v2903_v8 = vrot.slane %v2902_v43, 1  ;;  %v2940_v21 = vrot.slane %v2939_v16, 1 }
 0x209   :  { %v2810_v10 = vadd.f32 %v2809_v20, %v2535_v39  ;;  %v2867_v53 = vadd.f32 %v2866_v54, %v2865_v52  ;;  %v2904_v63 = vadd.f32 %v2903_v8, %v2902_v43  ;;  %v2941_v20 = vadd.f32 %v2940_v21, %v2939_v16 }
 0x20b   :  { %v2811_v6 = vadd.f32 %v2810_v10, %v2536_v13  ;;  %v2947_v23 = vmul.f32 0.00390625, %v2867_v53  ;;  %v2948_v10 = vmul.f32 0.00390625, %v2904_v63  ;;  %v2949_v33 = vmul.f32 0.00390625, %v2941_v20 }
 0x20d   :  { %v2812_v17 = vadd.f32 %v2811_v6, %v2537_v29  ;;  %v2955_v19 = vpack.c.bf16 %v2947_v23, %v2947_v23  ;;  %v2957_v30 = vpack.c.bf16 %v2949_v33, %v2949_v33 }
 0x20f   :  { %v2813_v36 = vadd.f32 %v2812_v17, %v2538_v48  ;;  %v2956_v48 = vpack.c.bf16 %v2948_v10, %v2948_v10 }
 0x211   :  { %v2814_v4 = vadd.f32 %v2813_v36, %v2539_v18  ;;  %v2994_v36 = vunpack.c.l.b16 %v2955_v19 }
 0x213   :  { %v2815_v41 = vadd.f32 %v2814_v4, %v2540_v40  ;;  %v2995_v40 = vunpack.c.l.b16 %v2956_v48  ;;  %v2996_v4 = vunpack.c.l.b16 %v2957_v30 }
 0x215   :  { %v2816_v14 = vadd.f32 %v2815_v41, %v2541_v24 }
 0x217   :  { %v2817_v50 = vadd.f32 %v2816_v14, %v2542_v62  ;;  %v3366_v62 = vld [vmem:[%s4925_s4] ss:$0 sm:$0xff] }
 0x219   :  { %v2818_v25 = vadd.f32 %v2817_v50, %v2543_v11 }
 0x21b   :  { %v2819_v46 = vadd.f32 %v2818_v25, %v2544_v32 }
 0x21d   :  { %v2820_v7 = vadd.f32 %v2819_v46, %v2545_v60 }
 0x21f   :  { %v2821_v55 = vadd.f32 %v2820_v7, %v2546_v28 }
 0x221   :  { %v2822_v59 = vadd.f32 %v2821_v55, %v2547_v9 }
 0x223   :  { %v2823_v26 = vadd.f32 %v2822_v59, %v2548_v3 }
 0x225   :  { %v2824_v5 = vadd.f32 %v2823_v26, %v2549_v44 }
 0x227   :  { %v2825_v27 = vrot.slane %v2824_v5, 4 }
 0x229   :  { %v2826_v37 = vadd.f32 %v2825_v27, %v2824_v5 }
 0x22b   :  { %v2827_v1 = vrot.slane %v2826_v37, 2 }
 0x22d   :  { %v2828_v39 = vadd.f32 %v2827_v1, %v2826_v37 }
 0x22f   :  { %v2829_v13 = vrot.slane %v2828_v39, 1 }
 0x231   :  { %v2830_v29 = vadd.f32 %v2829_v13, %v2828_v39 }
 0x233   :  { %v2946_v6 = vmul.f32 0.00390625, %v2830_v29 }
 0x235   :  { %v2954_v17 = vpack.c.bf16 %v2946_v6, %v2946_v6 }
 0x237   :  { %v2993_v18 = vunpack.c.l.b16 %v2954_v17 }
 0x239   :  { %v3004_v51 = vsel %vm3003_vm6, %v2993_v18, %v4868_v42 }
 0x23a   :  { %v3006_v24 = vsel %vm3005_vm7, %v2994_v36, %v3004_v51 }
 0x23b   :  { %v3008_v61 = vsel %vm3007_vm8, %v2995_v40, %v3006_v24 }
 0x23c   :  { %v3010_v41 = vsel %vm3009_vm9, %v2996_v4, %v3008_v61 }
 0x23d   :  { %v3011_v47 = vpack.c.b16 %v3010_v41, %v3010_v41 }
 0x23f   :  { %3794 = vmatmul.mubr.bf16.vlgmr.msra.gmra.mrb[124].mxu1 %v3011_v47 }
 0x312   :  { %v3095_v14 = vpop.f32.mrb[124].mxu1 }
 0x313   :  { %v3096_v57 = vadd.f32 %v3366_v62, %v3095_v14  ;;  %v3795_v11 = vpop.f32.mrb[125].mxu1 }
 0x314   :  { %v3098_v50 = vpop.f32.mrb[126].mxu1 }
 0x315   :  { %3101 = vst [vmem:[%s4926_s5] sm:$0xff] %v3096_v57  ;;  %v3796_v42 = vpop.f32.mrb[127].mxu1 }

</bundles_post_ra>
